<compile_context>
chip_gen: v7x
topology: tpu7x:2x2x1
jax: 0.10.0
libtpu: 0.0.40
codegen_flags: <defaults>
</compile_context>

<pallas_src>
import functools

import jax
import jax.numpy as jnp
from jax.experimental import pallas as pl
from jax.experimental.pallas import tpu as pltpu


# ----------------------------------------------------------------------------
# Fused whole-model kernel (one grid step per batch element).
# ----------------------------------------------------------------------------
def _ms_tcn2_kernel(x_ref, w_in_ref, b_in_ref, w_cat_ref, b_eff_ref,
                    w_out_ref, b_out_ref,
                    r_w_in_ref, r_b_in_ref, r_w_d_ref, r_b_d_ref,
                    r_w_p_ref, r_b_p_ref, r_w_out_ref, r_b_out_ref,
                    o_ref, *, pg_dils, r_dils, num_R, T):
    # Time-position iota, computed once and reused (JAX does not CSE it).
    t_idx = jax.lax.broadcasted_iota(jnp.int32, (1, T), 1)

    def taps3(v, d):
        # [v[:, t-d], v[:, t], v[:, t+d]] with zero padding at the boundaries,
        # built via XLU rolls + boundary masks (no scratch stores).
        left = jnp.where(t_idx >= d, pltpu.roll(v, d, axis=1), 0.0)
        right = jnp.where(t_idx < T - d, pltpu.roll(v, T - d, axis=1), 0.0)
        return [left, v, right]

    def bf16(v):
        return v.astype(jnp.bfloat16)

    # ---- Prediction Generation stage ----
    x = bf16(x_ref[0])                                          # (dim, T)
    f = jnp.dot(w_in_ref[...], x,
                preferred_element_type=jnp.float32) + b_in_ref[...]

    for i, (d1, d2) in enumerate(pg_dils):                      # static unroll
        taps = jnp.concatenate(taps3(f, d1) + taps3(f, d2), axis=0)  # (6F, T)
        acc = jnp.dot(w_cat_ref[i], bf16(taps),
                      preferred_element_type=jnp.float32) + b_eff_ref[i]
        f = jnp.maximum(acc, 0.0) + f                           # relu + residual

    out = jnp.dot(w_out_ref[...], bf16(f),
                  preferred_element_type=jnp.float32) + b_out_ref[...]
    o_ref[0, 0] = out

    # ---- Refinement stages ----
    for s in range(num_R):                                      # static unroll
        # Channel softmax of the previous stage's logits (kept in VMEM/vregs).
        m = jnp.max(out, axis=0, keepdims=True)
        e = jnp.exp(out - m)
        p = e * pl.reciprocal(jnp.sum(e, axis=0, keepdims=True), approx=True)

        h = jnp.dot(r_w_in_ref[s], bf16(p),
                    preferred_element_type=jnp.float32) + r_b_in_ref[s]
        for j, d in enumerate(r_dils):                          # static unroll
            taps = jnp.concatenate(taps3(h, d), axis=0)         # (3F, T)
            c = jnp.maximum(
                jnp.dot(r_w_d_ref[s, j], bf16(taps),
                        preferred_element_type=jnp.float32) + r_b_d_ref[s, j],
                0.0)
            h = h + jnp.dot(r_w_p_ref[s, j], bf16(c),
                            preferred_element_type=jnp.float32) + r_b_p_ref[s, j]
        out = jnp.dot(r_w_out_ref[s], bf16(h),
                      preferred_element_type=jnp.float32) + r_b_out_ref[s]
        o_ref[s + 1, 0] = out


def ms_tcn2_forward(x, params, num_layers_PG):
    pg = params["PG"]
    rs = params["Rs"]
    assert len(rs) >= 1
    N, dim, T = x.shape
    F = pg["w_in"].shape[0]
    C = pg["w_out"].shape[0]
    L_PG = num_layers_PG
    L_R = len(rs[0]["layers"])
    num_R = len(rs)
    pg_dils = tuple((2 ** (L_PG - 1 - i), 2 ** i) for i in range(L_PG))
    r_dils = tuple(2 ** j for j in range(L_R))

    bf = jnp.bfloat16

    # Fold the PG fusion 1x1 conv into the dilated-conv weights (exact in f32):
    #   fused = Wa@c1 + Wb@c2 + bf
    #         = sum_k (Wa@Wd1[k]) @ shift_{d1,k}(f) + sum_k (Wb@Wd2[k]) @ shift_{d2,k}(f)
    #           + (bf + Wa@bd1 + Wb@bd2)
    w_cat_list, b_eff_list = [], []
    for lyr in pg["layers"]:
        wa, wb = lyr["w_fuse_a"], lyr["w_fuse_b"]
        we1 = jnp.einsum("ab,kbc->kac", wa, lyr["w_d1"])        # (3, F, F)
        we2 = jnp.einsum("ab,kbc->kac", wb, lyr["w_d2"])        # (3, F, F)
        w_cat_list.append(jnp.concatenate(
            [we1[0], we1[1], we1[2], we2[0], we2[1], we2[2]], axis=1))  # (F, 6F)
        b_eff_list.append(lyr["b_fuse"] + wa @ lyr["b_d1"] + wb @ lyr["b_d2"])
    w_cat = jnp.stack(w_cat_list).astype(bf)                    # (L_PG, F, 6F)
    b_eff = jnp.stack(b_eff_list)                               # (L_PG, F, 1)

    # Stack the (identically shaped) refinement-stage weights along a stage axis.
    r_w_in = jnp.stack([r["w_in"] for r in rs]).astype(bf)      # (R, F, C)
    r_b_in = jnp.stack([r["b_in"] for r in rs])                 # (R, F, 1)
    r_w_d = jnp.stack([jnp.stack(
        [jnp.concatenate([l["w_d"][0], l["w_d"][1], l["w_d"][2]], axis=1)
         for l in r["layers"]]) for r in rs]).astype(bf)        # (R, L_R, F, 3F)
    r_b_d = jnp.stack([jnp.stack([l["b_d"] for l in r["layers"]])
                       for r in rs])                            # (R, L_R, F, 1)
    r_w_p = jnp.stack([jnp.stack([l["w_p"] for l in r["layers"]])
                       for r in rs]).astype(bf)                 # (R, L_R, F, F)
    r_b_p = jnp.stack([jnp.stack([l["b_p"] for l in r["layers"]])
                       for r in rs])                            # (R, L_R, F, 1)
    r_w_out = jnp.stack([r["w_out"] for r in rs]).astype(bf)    # (R, C, F)
    r_b_out = jnp.stack([r["b_out"] for r in rs])               # (R, C, 1)

    w_in = pg["w_in"].astype(bf)
    w_out = pg["w_out"].astype(bf)

    kernel = functools.partial(_ms_tcn2_kernel, pg_dils=pg_dils, r_dils=r_dils,
                               num_R=num_R, T=T)
    return pl.pallas_call(
        kernel,
        out_shape=jax.ShapeDtypeStruct((num_R + 1, N, C, T), jnp.float32),
        grid=(N,),
        in_specs=[
            pl.BlockSpec((1, dim, T), lambda n: (n, 0, 0)),
            pl.BlockSpec((F, dim), lambda n: (0, 0)),
            pl.BlockSpec((F, 1), lambda n: (0, 0)),
            pl.BlockSpec((L_PG, F, 6 * F), lambda n: (0, 0, 0)),
            pl.BlockSpec((L_PG, F, 1), lambda n: (0, 0, 0)),
            pl.BlockSpec((C, F), lambda n: (0, 0)),
            pl.BlockSpec((C, 1), lambda n: (0, 0)),
            pl.BlockSpec((num_R, F, C), lambda n: (0, 0, 0)),
            pl.BlockSpec((num_R, F, 1), lambda n: (0, 0, 0)),
            pl.BlockSpec((num_R, L_R, F, 3 * F), lambda n: (0, 0, 0, 0)),
            pl.BlockSpec((num_R, L_R, F, 1), lambda n: (0, 0, 0, 0)),
            pl.BlockSpec((num_R, L_R, F, F), lambda n: (0, 0, 0, 0)),
            pl.BlockSpec((num_R, L_R, F, 1), lambda n: (0, 0, 0, 0)),
            pl.BlockSpec((num_R, C, F), lambda n: (0, 0, 0)),
            pl.BlockSpec((num_R, C, 1), lambda n: (0, 0, 0)),
        ],
        out_specs=pl.BlockSpec((num_R + 1, 1, C, T), lambda n: (0, n, 0, 0)),
        compiler_params=pltpu.CompilerParams(
            dimension_semantics=("parallel",),
            vmem_limit_bytes=32 * 1024 * 1024),
    )(x, w_in, pg["b_in"], w_cat, b_eff, w_out, pg["b_out"],
      r_w_in, r_b_in, r_w_d, r_b_d, r_w_p, r_b_p, r_w_out, r_b_out)


# ----------------------------------------------------------------------------
# Parameter init (deterministic, synthetic)
# ----------------------------------------------------------------------------
def _init(key, shape, scale=0.1):
    return scale * jax.random.normal(key, shape, dtype=jnp.float32)


def init_params(key, num_layers_PG, num_layers_R, num_R, num_f_maps, dim,
                num_classes):
    F = num_f_maps
    keys = iter(jax.random.split(key, 1024))
    pg = {
        "w_in": _init(next(keys), (F, dim)),
        "b_in": _init(next(keys), (F, 1)),
        "w_out": _init(next(keys), (num_classes, F)),
        "b_out": _init(next(keys), (num_classes, 1)),
        "layers": [],
    }
    for _ in range(num_layers_PG):
        pg["layers"].append({
            "w_d1": _init(next(keys), (3, F, F)),
            "b_d1": _init(next(keys), (F, 1)),
            "w_d2": _init(next(keys), (3, F, F)),
            "b_d2": _init(next(keys), (F, 1)),
            "w_fuse_a": _init(next(keys), (F, F)),   # fusion W[:, :F]
            "w_fuse_b": _init(next(keys), (F, F)),   # fusion W[:, F:]
            "b_fuse": _init(next(keys), (F, 1)),
        })
    rs = []
    for _ in range(num_R):
        r = {
            "w_in": _init(next(keys), (F, num_classes)),
            "b_in": _init(next(keys), (F, 1)),
            "w_out": _init(next(keys), (num_classes, F)),
            "b_out": _init(next(keys), (num_classes, 1)),
            "layers": [],
        }
        for _ in range(num_layers_R):
            r["layers"].append({
                "w_d": _init(next(keys), (3, F, F)),
                "b_d": _init(next(keys), (F, 1)),
                "w_p": _init(next(keys), (F, F)),
                "b_p": _init(next(keys), (F, 1)),
            })
        rs.append(r)
    return {"PG": pg, "Rs": rs}


# ----------------------------------------------------------------------------
# Pure-JAX reference (validates the fused/folded kernel)
# ----------------------------------------------------------------------------
_HI = jax.lax.Precision.HIGHEST


def _ref_dot(w, x):
    return jnp.einsum("oc,nct->not", w, x, precision=_HI)


def _ref_dconv3(x, w, b, d):
    N, C, T = x.shape
    xp = jnp.pad(x, ((0, 0), (0, 0), (d, d)))
    out = b[None]
    for k in range(3):
        s = d + (k - 1) * d
        out = out + jnp.einsum("oc,nct->not", w[k], xp[:, :, s:s + T],
                               precision=_HI)
    return out


def ref_forward(x, params, num_layers_PG):
    pg = params["PG"]
    f = _ref_dot(pg["w_in"], x) + pg["b_in"][None]
    for i, lyr in enumerate(pg["layers"]):
        d1, d2 = 2 ** (num_layers_PG - 1 - i), 2 ** i
        c1 = _ref_dconv3(f, lyr["w_d1"], lyr["b_d1"], d1)
        c2 = _ref_dconv3(f, lyr["w_d2"], lyr["b_d2"], d2)
        fused = (_ref_dot(lyr["w_fuse_a"], c1) + _ref_dot(lyr["w_fuse_b"], c2)
                 + lyr["b_fuse"][None])
        f = jnp.maximum(fused, 0.0) + f
    out = _ref_dot(pg["w_out"], f) + pg["b_out"][None]
    outputs = [out]
    for r in params["Rs"]:
        h = _ref_dot(r["w_in"], jax.nn.softmax(out, axis=1)) + r["b_in"][None]
        for j, lyr in enumerate(r["layers"]):
            c = jnp.maximum(_ref_dconv3(h, lyr["w_d"], lyr["b_d"], 2 ** j), 0.0)
            h = h + _ref_dot(lyr["w_p"], c) + lyr["b_p"][None]
        out = _ref_dot(r["w_out"], h) + r["b_out"][None]
        outputs.append(out)
    return jnp.stack(outputs, axis=0)


if __name__ == "__main__":
    num_layers_PG = 3
    num_layers_R = 2
    num_R = 2
    num_f_maps = 8
    dim = 8
    num_classes = 6
    N, T = 2, 128   # lane-dense time axis (multiple of 128); N=2 parallel grid

    key = jax.random.PRNGKey(0)
    k_par, k_x = jax.random.split(key)
    params = init_params(k_par, num_layers_PG, num_layers_R, num_R,
                         num_f_maps, dim, num_classes)
    x = jax.random.normal(k_x, (N, dim, T), dtype=jnp.float32)

    fwd = jax.jit(functools.partial(ms_tcn2_forward, num_layers_PG=num_layers_PG))
    out = jax.block_until_ready(fwd(x, params))
    assert out.shape == (num_R + 1, N, num_classes, T), out.shape

    ref = jax.block_until_ready(ref_forward(x, params, num_layers_PG))
    err = float(jnp.max(jnp.abs(out - ref)))
    assert err < 2e-2, f"max abs err vs reference: {err}"
    print("KERNEL_OK")
</pallas_src>

<mosaic_0001>
module attributes {stable_mosaic.version = 11 : i64} {
  func.func @_ms_tcn2_kernel(%arg0: i32, %arg1: memref<1x8x128xf32, #tpu.memory_space<vmem>>, %arg2: memref<8x8xbf16, #tpu.memory_space<vmem>>, %arg3: memref<8x1xf32, #tpu.memory_space<vmem>>, %arg4: memref<3x8x48xbf16, #tpu.memory_space<vmem>>, %arg5: memref<3x8x1xf32, #tpu.memory_space<vmem>>, %arg6: memref<6x8xbf16, #tpu.memory_space<vmem>>, %arg7: memref<6x1xf32, #tpu.memory_space<vmem>>, %arg8: memref<2x8x6xbf16, #tpu.memory_space<vmem>>, %arg9: memref<2x8x1xf32, #tpu.memory_space<vmem>>, %arg10: memref<2x2x8x24xbf16, #tpu.memory_space<vmem>>, %arg11: memref<2x2x8x1xf32, #tpu.memory_space<vmem>>, %arg12: memref<2x2x8x8xbf16, #tpu.memory_space<vmem>>, %arg13: memref<2x2x8x1xf32, #tpu.memory_space<vmem>>, %arg14: memref<2x6x8xbf16, #tpu.memory_space<vmem>>, %arg15: memref<2x6x1xf32, #tpu.memory_space<vmem>>, %arg16: memref<3x1x6x128xf32, #tpu.memory_space<vmem>>) attributes {dimension_semantics = [#tpu.dimension_semantics<parallel>], iteration_bounds = array<i64: 2>, scalar_prefetch = 0 : i64, scratch_operands = 0 : i64, tpu.core_type = #tpu.core_type<tc>, window_params = [{transform_indices = @transform_0, window_bounds = array<i64: 1, 8, 128>}, {pipeline_mode = #tpu.pipeline_mode<synchronous>, transform_indices = @transform_1, window_bounds = array<i64: 8, 8>}, {pipeline_mode = #tpu.pipeline_mode<synchronous>, transform_indices = @transform_2, window_bounds = array<i64: 8, 1>}, {pipeline_mode = #tpu.pipeline_mode<synchronous>, transform_indices = @transform_3, window_bounds = array<i64: 3, 8, 48>}, {pipeline_mode = #tpu.pipeline_mode<synchronous>, transform_indices = @transform_4, window_bounds = array<i64: 3, 8, 1>}, {pipeline_mode = #tpu.pipeline_mode<synchronous>, transform_indices = @transform_5, window_bounds = array<i64: 6, 8>}, {pipeline_mode = #tpu.pipeline_mode<synchronous>, transform_indices = @transform_6, window_bounds = array<i64: 6, 1>}, {pipeline_mode = #tpu.pipeline_mode<synchronous>, transform_indices = @transform_7, window_bounds = array<i64: 2, 8, 6>}, {pipeline_mode = #tpu.pipeline_mode<synchronous>, transform_indices = @transform_8, window_bounds = array<i64: 2, 8, 1>}, {pipeline_mode = #tpu.pipeline_mode<synchronous>, transform_indices = @transform_9, window_bounds = array<i64: 2, 2, 8, 24>}, {pipeline_mode = #tpu.pipeline_mode<synchronous>, transform_indices = @transform_10, window_bounds = array<i64: 2, 2, 8, 1>}, {pipeline_mode = #tpu.pipeline_mode<synchronous>, transform_indices = @transform_11, window_bounds = array<i64: 2, 2, 8, 8>}, {pipeline_mode = #tpu.pipeline_mode<synchronous>, transform_indices = @transform_12, window_bounds = array<i64: 2, 2, 8, 1>}, {pipeline_mode = #tpu.pipeline_mode<synchronous>, transform_indices = @transform_13, window_bounds = array<i64: 2, 6, 8>}, {pipeline_mode = #tpu.pipeline_mode<synchronous>, transform_indices = @transform_14, window_bounds = array<i64: 2, 6, 1>}, {transform_indices = @transform_15, window_bounds = array<i64: 3, 1, 6, 128>}]} {
    %0 = tpu.iota {dimensions = array<i32: 1>} : vector<1x128xi32>
    %c0 = arith.constant 0 : index
    %c0_0 = arith.constant 0 : index
    %c0_1 = arith.constant 0 : index
    %1 = vector.load %arg1[%c0, %c0_0, %c0_1] : memref<1x8x128xf32, #tpu.memory_space<vmem>>, vector<1x8x128xf32>
    %2 = vector.shape_cast %1 : vector<1x8x128xf32> to vector<8x128xf32>
    %3 = arith.truncf %2 : vector<8x128xf32> to vector<8x128xbf16>
    %c0_2 = arith.constant 0 : index
    %c0_3 = arith.constant 0 : index
    %4 = vector.load %arg2[%c0_2, %c0_3] : memref<8x8xbf16, #tpu.memory_space<vmem>>, vector<8x8xbf16>
    %cst = arith.constant dense<0.000000e+00> : vector<8x128xf32>
    %5 = tpu.matmul %4, %3, %cst {dimension_numbers = #tpu.dot_dimension_numbers<[1], [0], [0], [1], [0, 0, 1, 1], [], []>} : vector<8x8xbf16>, vector<8x128xbf16>, vector<8x128xf32> -> vector<8x128xf32>
    %c0_4 = arith.constant 0 : index
    %c0_5 = arith.constant 0 : index
    %6 = vector.load %arg3[%c0_4, %c0_5] : memref<8x1xf32, #tpu.memory_space<vmem>>, vector<8x1xf32>
    %7 = vector.broadcast %6 : vector<8x1xf32> to vector<8x128xf32>
    %8 = arith.addf %5, %7 : vector<8x128xf32>
    %c4_i32 = arith.constant 4 : i32
    %9 = vector.broadcast %c4_i32 : i32 to vector<1x128xi32>
    %10 = arith.cmpi sge, %0, %9 : vector<1x128xi32>
    %c4_i32_6 = arith.constant 4 : i32
    %11 = tpu.dynamic_rotate %8 by %c4_i32_6 dim 1 : vector<8x128xf32>, i32 -> vector<8x128xf32>
    %cst_7 = arith.constant 0.000000e+00 : f32
    %12 = vector.shape_cast %10 : vector<1x128xi1> to vector<1x128xi1>
    %13 = vector.broadcast %12 : vector<1x128xi1> to vector<8x128xi1>
    %14 = vector.broadcast %cst_7 : f32 to vector<8x128xf32>
    %15 = arith.select %13, %11, %14 : vector<8x128xi1>, vector<8x128xf32>
    %c124_i32 = arith.constant 124 : i32
    %16 = vector.broadcast %c124_i32 : i32 to vector<1x128xi32>
    %17 = arith.cmpi slt, %0, %16 : vector<1x128xi32>
    %c124_i32_8 = arith.constant 124 : i32
    %18 = tpu.dynamic_rotate %8 by %c124_i32_8 dim 1 : vector<8x128xf32>, i32 -> vector<8x128xf32>
    %cst_9 = arith.constant 0.000000e+00 : f32
    %19 = vector.shape_cast %17 : vector<1x128xi1> to vector<1x128xi1>
    %20 = vector.broadcast %19 : vector<1x128xi1> to vector<8x128xi1>
    %21 = vector.broadcast %cst_9 : f32 to vector<8x128xf32>
    %22 = arith.select %20, %18, %21 : vector<8x128xi1>, vector<8x128xf32>
    %c1_i32 = arith.constant 1 : i32
    %23 = vector.broadcast %c1_i32 : i32 to vector<1x128xi32>
    %24 = arith.cmpi sge, %0, %23 : vector<1x128xi32>
    %c1_i32_10 = arith.constant 1 : i32
    %25 = tpu.dynamic_rotate %8 by %c1_i32_10 dim 1 : vector<8x128xf32>, i32 -> vector<8x128xf32>
    %cst_11 = arith.constant 0.000000e+00 : f32
    %26 = vector.shape_cast %24 : vector<1x128xi1> to vector<1x128xi1>
    %27 = vector.broadcast %26 : vector<1x128xi1> to vector<8x128xi1>
    %28 = vector.broadcast %cst_11 : f32 to vector<8x128xf32>
    %29 = arith.select %27, %25, %28 : vector<8x128xi1>, vector<8x128xf32>
    %c127_i32 = arith.constant 127 : i32
    %30 = vector.broadcast %c127_i32 : i32 to vector<1x128xi32>
    %31 = arith.cmpi slt, %0, %30 : vector<1x128xi32>
    %c127_i32_12 = arith.constant 127 : i32
    %32 = tpu.dynamic_rotate %8 by %c127_i32_12 dim 1 : vector<8x128xf32>, i32 -> vector<8x128xf32>
    %cst_13 = arith.constant 0.000000e+00 : f32
    %33 = vector.shape_cast %31 : vector<1x128xi1> to vector<1x128xi1>
    %34 = vector.broadcast %33 : vector<1x128xi1> to vector<8x128xi1>
    %35 = vector.broadcast %cst_13 : f32 to vector<8x128xf32>
    %36 = arith.select %34, %32, %35 : vector<8x128xi1>, vector<8x128xf32>
    %37 = tpu.concatenate %15, %8, %22, %29, %8, %36 in 0 : vector<8x128xf32>, vector<8x128xf32>, vector<8x128xf32>, vector<8x128xf32>, vector<8x128xf32>, vector<8x128xf32> -> vector<48x128xf32>
    %c0_14 = arith.constant 0 : index
    %c0_15 = arith.constant 0 : index
    %c0_16 = arith.constant 0 : index
    %38 = vector.load %arg4[%c0_14, %c0_15, %c0_16] : memref<3x8x48xbf16, #tpu.memory_space<vmem>>, vector<1x8x48xbf16>
    %39 = vector.shape_cast %38 : vector<1x8x48xbf16> to vector<8x48xbf16>
    %40 = arith.truncf %37 : vector<48x128xf32> to vector<48x128xbf16>
    %cst_17 = arith.constant dense<0.000000e+00> : vector<8x128xf32>
    %41 = tpu.matmul %39, %40, %cst_17 {dimension_numbers = #tpu.dot_dimension_numbers<[1], [0], [0], [1], [0, 0, 1, 1], [], []>} : vector<8x48xbf16>, vector<48x128xbf16>, vector<8x128xf32> -> vector<8x128xf32>
    %c0_18 = arith.constant 0 : index
    %c0_19 = arith.constant 0 : index
    %c0_20 = arith.constant 0 : index
    %42 = vector.load %arg5[%c0_18, %c0_19, %c0_20] : memref<3x8x1xf32, #tpu.memory_space<vmem>>, vector<1x8x1xf32>
    %43 = vector.shape_cast %42 : vector<1x8x1xf32> to vector<8x1xf32>
    %44 = vector.broadcast %43 : vector<8x1xf32> to vector<8x128xf32>
    %45 = arith.addf %41, %44 : vector<8x128xf32>
    %cst_21 = arith.constant 0.000000e+00 : f32
    %46 = vector.broadcast %cst_21 : f32 to vector<8x128xf32>
    %47 = arith.maximumf %45, %46 : vector<8x128xf32>
    %48 = arith.addf %47, %8 : vector<8x128xf32>
    %c2_i32 = arith.constant 2 : i32
    %49 = vector.broadcast %c2_i32 : i32 to vector<1x128xi32>
    %50 = arith.cmpi sge, %0, %49 : vector<1x128xi32>
    %c2_i32_22 = arith.constant 2 : i32
    %51 = tpu.dynamic_rotate %48 by %c2_i32_22 dim 1 : vector<8x128xf32>, i32 -> vector<8x128xf32>
    %cst_23 = arith.constant 0.000000e+00 : f32
    %52 = vector.shape_cast %50 : vector<1x128xi1> to vector<1x128xi1>
    %53 = vector.broadcast %52 : vector<1x128xi1> to vector<8x128xi1>
    %54 = vector.broadcast %cst_23 : f32 to vector<8x128xf32>
    %55 = arith.select %53, %51, %54 : vector<8x128xi1>, vector<8x128xf32>
    %c126_i32 = arith.constant 126 : i32
    %56 = vector.broadcast %c126_i32 : i32 to vector<1x128xi32>
    %57 = arith.cmpi slt, %0, %56 : vector<1x128xi32>
    %c126_i32_24 = arith.constant 126 : i32
    %58 = tpu.dynamic_rotate %48 by %c126_i32_24 dim 1 : vector<8x128xf32>, i32 -> vector<8x128xf32>
    %cst_25 = arith.constant 0.000000e+00 : f32
    %59 = vector.shape_cast %57 : vector<1x128xi1> to vector<1x128xi1>
    %60 = vector.broadcast %59 : vector<1x128xi1> to vector<8x128xi1>
    %61 = vector.broadcast %cst_25 : f32 to vector<8x128xf32>
    %62 = arith.select %60, %58, %61 : vector<8x128xi1>, vector<8x128xf32>
    %c2_i32_26 = arith.constant 2 : i32
    %63 = vector.broadcast %c2_i32_26 : i32 to vector<1x128xi32>
    %64 = arith.cmpi sge, %0, %63 : vector<1x128xi32>
    %c2_i32_27 = arith.constant 2 : i32
    %65 = tpu.dynamic_rotate %48 by %c2_i32_27 dim 1 : vector<8x128xf32>, i32 -> vector<8x128xf32>
    %cst_28 = arith.constant 0.000000e+00 : f32
    %66 = vector.shape_cast %64 : vector<1x128xi1> to vector<1x128xi1>
    %67 = vector.broadcast %66 : vector<1x128xi1> to vector<8x128xi1>
    %68 = vector.broadcast %cst_28 : f32 to vector<8x128xf32>
    %69 = arith.select %67, %65, %68 : vector<8x128xi1>, vector<8x128xf32>
    %c126_i32_29 = arith.constant 126 : i32
    %70 = vector.broadcast %c126_i32_29 : i32 to vector<1x128xi32>
    %71 = arith.cmpi slt, %0, %70 : vector<1x128xi32>
    %c126_i32_30 = arith.constant 126 : i32
    %72 = tpu.dynamic_rotate %48 by %c126_i32_30 dim 1 : vector<8x128xf32>, i32 -> vector<8x128xf32>
    %cst_31 = arith.constant 0.000000e+00 : f32
    %73 = vector.shape_cast %71 : vector<1x128xi1> to vector<1x128xi1>
    %74 = vector.broadcast %73 : vector<1x128xi1> to vector<8x128xi1>
    %75 = vector.broadcast %cst_31 : f32 to vector<8x128xf32>
    %76 = arith.select %74, %72, %75 : vector<8x128xi1>, vector<8x128xf32>
    %77 = tpu.concatenate %55, %48, %62, %69, %48, %76 in 0 : vector<8x128xf32>, vector<8x128xf32>, vector<8x128xf32>, vector<8x128xf32>, vector<8x128xf32>, vector<8x128xf32> -> vector<48x128xf32>
    %c1 = arith.constant 1 : index
    %c0_32 = arith.constant 0 : index
    %c0_33 = arith.constant 0 : index
    %78 = vector.load %arg4[%c1, %c0_32, %c0_33] : memref<3x8x48xbf16, #tpu.memory_space<vmem>>, vector<1x8x48xbf16>
    %79 = vector.shape_cast %78 : vector<1x8x48xbf16> to vector<8x48xbf16>
    %80 = arith.truncf %77 : vector<48x128xf32> to vector<48x128xbf16>
    %cst_34 = arith.constant dense<0.000000e+00> : vector<8x128xf32>
    %81 = tpu.matmul %79, %80, %cst_34 {dimension_numbers = #tpu.dot_dimension_numbers<[1], [0], [0], [1], [0, 0, 1, 1], [], []>} : vector<8x48xbf16>, vector<48x128xbf16>, vector<8x128xf32> -> vector<8x128xf32>
    %c1_35 = arith.constant 1 : index
    %c0_36 = arith.constant 0 : index
    %c0_37 = arith.constant 0 : index
    %82 = vector.load %arg5[%c1_35, %c0_36, %c0_37] : memref<3x8x1xf32, #tpu.memory_space<vmem>>, vector<1x8x1xf32>
    %83 = vector.shape_cast %82 : vector<1x8x1xf32> to vector<8x1xf32>
    %84 = vector.broadcast %83 : vector<8x1xf32> to vector<8x128xf32>
    %85 = arith.addf %81, %84 : vector<8x128xf32>
    %cst_38 = arith.constant 0.000000e+00 : f32
    %86 = vector.broadcast %cst_38 : f32 to vector<8x128xf32>
    %87 = arith.maximumf %85, %86 : vector<8x128xf32>
    %88 = arith.addf %87, %48 : vector<8x128xf32>
    %c1_i32_39 = arith.constant 1 : i32
    %89 = vector.broadcast %c1_i32_39 : i32 to vector<1x128xi32>
    %90 = arith.cmpi sge, %0, %89 : vector<1x128xi32>
    %c1_i32_40 = arith.constant 1 : i32
    %91 = tpu.dynamic_rotate %88 by %c1_i32_40 dim 1 : vector<8x128xf32>, i32 -> vector<8x128xf32>
    %cst_41 = arith.constant 0.000000e+00 : f32
    %92 = vector.shape_cast %90 : vector<1x128xi1> to vector<1x128xi1>
    %93 = vector.broadcast %92 : vector<1x128xi1> to vector<8x128xi1>
    %94 = vector.broadcast %cst_41 : f32 to vector<8x128xf32>
    %95 = arith.select %93, %91, %94 : vector<8x128xi1>, vector<8x128xf32>
    %c127_i32_42 = arith.constant 127 : i32
    %96 = vector.broadcast %c127_i32_42 : i32 to vector<1x128xi32>
    %97 = arith.cmpi slt, %0, %96 : vector<1x128xi32>
    %c127_i32_43 = arith.constant 127 : i32
    %98 = tpu.dynamic_rotate %88 by %c127_i32_43 dim 1 : vector<8x128xf32>, i32 -> vector<8x128xf32>
    %cst_44 = arith.constant 0.000000e+00 : f32
    %99 = vector.shape_cast %97 : vector<1x128xi1> to vector<1x128xi1>
    %100 = vector.broadcast %99 : vector<1x128xi1> to vector<8x128xi1>
    %101 = vector.broadcast %cst_44 : f32 to vector<8x128xf32>
    %102 = arith.select %100, %98, %101 : vector<8x128xi1>, vector<8x128xf32>
    %c4_i32_45 = arith.constant 4 : i32
    %103 = vector.broadcast %c4_i32_45 : i32 to vector<1x128xi32>
    %104 = arith.cmpi sge, %0, %103 : vector<1x128xi32>
    %c4_i32_46 = arith.constant 4 : i32
    %105 = tpu.dynamic_rotate %88 by %c4_i32_46 dim 1 : vector<8x128xf32>, i32 -> vector<8x128xf32>
    %cst_47 = arith.constant 0.000000e+00 : f32
    %106 = vector.shape_cast %104 : vector<1x128xi1> to vector<1x128xi1>
    %107 = vector.broadcast %106 : vector<1x128xi1> to vector<8x128xi1>
    %108 = vector.broadcast %cst_47 : f32 to vector<8x128xf32>
    %109 = arith.select %107, %105, %108 : vector<8x128xi1>, vector<8x128xf32>
    %c124_i32_48 = arith.constant 124 : i32
    %110 = vector.broadcast %c124_i32_48 : i32 to vector<1x128xi32>
    %111 = arith.cmpi slt, %0, %110 : vector<1x128xi32>
    %c124_i32_49 = arith.constant 124 : i32
    %112 = tpu.dynamic_rotate %88 by %c124_i32_49 dim 1 : vector<8x128xf32>, i32 -> vector<8x128xf32>
    %cst_50 = arith.constant 0.000000e+00 : f32
    %113 = vector.shape_cast %111 : vector<1x128xi1> to vector<1x128xi1>
    %114 = vector.broadcast %113 : vector<1x128xi1> to vector<8x128xi1>
    %115 = vector.broadcast %cst_50 : f32 to vector<8x128xf32>
    %116 = arith.select %114, %112, %115 : vector<8x128xi1>, vector<8x128xf32>
    %117 = tpu.concatenate %95, %88, %102, %109, %88, %116 in 0 : vector<8x128xf32>, vector<8x128xf32>, vector<8x128xf32>, vector<8x128xf32>, vector<8x128xf32>, vector<8x128xf32> -> vector<48x128xf32>
    %c2 = arith.constant 2 : index
    %c0_51 = arith.constant 0 : index
    %c0_52 = arith.constant 0 : index
    %118 = vector.load %arg4[%c2, %c0_51, %c0_52] : memref<3x8x48xbf16, #tpu.memory_space<vmem>>, vector<1x8x48xbf16>
    %119 = vector.shape_cast %118 : vector<1x8x48xbf16> to vector<8x48xbf16>
    %120 = arith.truncf %117 : vector<48x128xf32> to vector<48x128xbf16>
    %cst_53 = arith.constant dense<0.000000e+00> : vector<8x128xf32>
    %121 = tpu.matmul %119, %120, %cst_53 {dimension_numbers = #tpu.dot_dimension_numbers<[1], [0], [0], [1], [0, 0, 1, 1], [], []>} : vector<8x48xbf16>, vector<48x128xbf16>, vector<8x128xf32> -> vector<8x128xf32>
    %c2_54 = arith.constant 2 : index
    %c0_55 = arith.constant 0 : index
    %c0_56 = arith.constant 0 : index
    %122 = vector.load %arg5[%c2_54, %c0_55, %c0_56] : memref<3x8x1xf32, #tpu.memory_space<vmem>>, vector<1x8x1xf32>
    %123 = vector.shape_cast %122 : vector<1x8x1xf32> to vector<8x1xf32>
    %124 = vector.broadcast %123 : vector<8x1xf32> to vector<8x128xf32>
    %125 = arith.addf %121, %124 : vector<8x128xf32>
    %cst_57 = arith.constant 0.000000e+00 : f32
    %126 = vector.broadcast %cst_57 : f32 to vector<8x128xf32>
    %127 = arith.maximumf %125, %126 : vector<8x128xf32>
    %128 = arith.addf %127, %88 : vector<8x128xf32>
    %c0_58 = arith.constant 0 : index
    %c0_59 = arith.constant 0 : index
    %129 = vector.load %arg6[%c0_58, %c0_59] : memref<6x8xbf16, #tpu.memory_space<vmem>>, vector<6x8xbf16>
    %130 = arith.truncf %128 : vector<8x128xf32> to vector<8x128xbf16>
    %cst_60 = arith.constant dense<0.000000e+00> : vector<6x128xf32>
    %131 = tpu.matmul %129, %130, %cst_60 {dimension_numbers = #tpu.dot_dimension_numbers<[1], [0], [0], [1], [0, 0, 1, 1], [], []>} : vector<6x8xbf16>, vector<8x128xbf16>, vector<6x128xf32> -> vector<6x128xf32>
    %c0_61 = arith.constant 0 : index
    %c0_62 = arith.constant 0 : index
    %132 = vector.load %arg7[%c0_61, %c0_62] : memref<6x1xf32, #tpu.memory_space<vmem>>, vector<6x1xf32>
    %133 = vector.broadcast %132 : vector<6x1xf32> to vector<6x128xf32>
    %134 = arith.addf %131, %133 : vector<6x128xf32>
    %c0_63 = arith.constant 0 : index
    %c0_64 = arith.constant 0 : index
    %c0_65 = arith.constant 0 : index
    %c0_66 = arith.constant 0 : index
    %135 = vector.load %arg16[%c0_63, %c0_64, %c0_65, %c0_66] : memref<3x1x6x128xf32, #tpu.memory_space<vmem>>, vector<1x1x6x128xf32>
    %136 = vector.shape_cast %135 : vector<1x1x6x128xf32> to vector<6x128xf32>
    %137 = vector.shape_cast %134 : vector<6x128xf32> to vector<1x1x6x128xf32>
    tpu.vector_store %arg16[%c0_63, %c0_64, %c0_65, %c0_66], %137 {strides = array<i32>} : memref<3x1x6x128xf32, #tpu.memory_space<vmem>>, vector<1x1x6x128xf32>,
    %cst_67 = arith.constant dense<0xFF800000> : vector<128xf32>
    %138 = vector.multi_reduction <maximumf>, %134, %cst_67 [0] : vector<6x128xf32> to vector<128xf32>
    %139 = vector.shape_cast %138 : vector<128xf32> to vector<1x128xf32>
    %140 = vector.broadcast %139 : vector<1x128xf32> to vector<6x128xf32>
    %141 = arith.subf %134, %140 : vector<6x128xf32>
    %142 = math.exp %141 : vector<6x128xf32>
    %cst_68 = arith.constant dense<0.000000e+00> : vector<128xf32>
    %143 = vector.multi_reduction <add>, %142, %cst_68 [0] : vector<6x128xf32> to vector<128xf32>
    %144 = vector.shape_cast %143 : vector<128xf32> to vector<1x128xf32>
    %145 = tpu.reciprocal %144 {approx = true} : vector<1x128xf32> -> vector<1x128xf32>
    %146 = vector.broadcast %145 : vector<1x128xf32> to vector<6x128xf32>
    %147 = arith.mulf %142, %146 : vector<6x128xf32>
    %c0_69 = arith.constant 0 : index
    %c0_70 = arith.constant 0 : index
    %c0_71 = arith.constant 0 : index
    %148 = vector.load %arg8[%c0_69, %c0_70, %c0_71] : memref<2x8x6xbf16, #tpu.memory_space<vmem>>, vector<1x8x6xbf16>
    %149 = vector.shape_cast %148 : vector<1x8x6xbf16> to vector<8x6xbf16>
    %150 = arith.truncf %147 : vector<6x128xf32> to vector<6x128xbf16>
    %cst_72 = arith.constant dense<0.000000e+00> : vector<8x128xf32>
    %151 = tpu.matmul %149, %150, %cst_72 {dimension_numbers = #tpu.dot_dimension_numbers<[1], [0], [0], [1], [0, 0, 1, 1], [], []>} : vector<8x6xbf16>, vector<6x128xbf16>, vector<8x128xf32> -> vector<8x128xf32>
    %c0_73 = arith.constant 0 : index
    %c0_74 = arith.constant 0 : index
    %c0_75 = arith.constant 0 : index
    %152 = vector.load %arg9[%c0_73, %c0_74, %c0_75] : memref<2x8x1xf32, #tpu.memory_space<vmem>>, vector<1x8x1xf32>
    %153 = vector.shape_cast %152 : vector<1x8x1xf32> to vector<8x1xf32>
    %154 = vector.broadcast %153 : vector<8x1xf32> to vector<8x128xf32>
    %155 = arith.addf %151, %154 : vector<8x128xf32>
    %c1_i32_76 = arith.constant 1 : i32
    %156 = vector.broadcast %c1_i32_76 : i32 to vector<1x128xi32>
    %157 = arith.cmpi sge, %0, %156 : vector<1x128xi32>
    %c1_i32_77 = arith.constant 1 : i32
    %158 = tpu.dynamic_rotate %155 by %c1_i32_77 dim 1 : vector<8x128xf32>, i32 -> vector<8x128xf32>
    %cst_78 = arith.constant 0.000000e+00 : f32
    %159 = vector.shape_cast %157 : vector<1x128xi1> to vector<1x128xi1>
    %160 = vector.broadcast %159 : vector<1x128xi1> to vector<8x128xi1>
    %161 = vector.broadcast %cst_78 : f32 to vector<8x128xf32>
    %162 = arith.select %160, %158, %161 : vector<8x128xi1>, vector<8x128xf32>
    %c127_i32_79 = arith.constant 127 : i32
    %163 = vector.broadcast %c127_i32_79 : i32 to vector<1x128xi32>
    %164 = arith.cmpi slt, %0, %163 : vector<1x128xi32>
    %c127_i32_80 = arith.constant 127 : i32
    %165 = tpu.dynamic_rotate %155 by %c127_i32_80 dim 1 : vector<8x128xf32>, i32 -> vector<8x128xf32>
    %cst_81 = arith.constant 0.000000e+00 : f32
    %166 = vector.shape_cast %164 : vector<1x128xi1> to vector<1x128xi1>
    %167 = vector.broadcast %166 : vector<1x128xi1> to vector<8x128xi1>
    %168 = vector.broadcast %cst_81 : f32 to vector<8x128xf32>
    %169 = arith.select %167, %165, %168 : vector<8x128xi1>, vector<8x128xf32>
    %170 = tpu.concatenate %162, %155, %169 in 0 : vector<8x128xf32>, vector<8x128xf32>, vector<8x128xf32> -> vector<24x128xf32>
    %c0_82 = arith.constant 0 : index
    %c0_83 = arith.constant 0 : index
    %c0_84 = arith.constant 0 : index
    %c0_85 = arith.constant 0 : index
    %171 = vector.load %arg10[%c0_82, %c0_83, %c0_84, %c0_85] : memref<2x2x8x24xbf16, #tpu.memory_space<vmem>>, vector<1x1x8x24xbf16>
    %172 = vector.shape_cast %171 : vector<1x1x8x24xbf16> to vector<8x24xbf16>
    %173 = arith.truncf %170 : vector<24x128xf32> to vector<24x128xbf16>
    %cst_86 = arith.constant dense<0.000000e+00> : vector<8x128xf32>
    %174 = tpu.matmul %172, %173, %cst_86 {dimension_numbers = #tpu.dot_dimension_numbers<[1], [0], [0], [1], [0, 0, 1, 1], [], []>} : vector<8x24xbf16>, vector<24x128xbf16>, vector<8x128xf32> -> vector<8x128xf32>
    %c0_87 = arith.constant 0 : index
    %c0_88 = arith.constant 0 : index
    %c0_89 = arith.constant 0 : index
    %c0_90 = arith.constant 0 : index
    %175 = vector.load %arg11[%c0_87, %c0_88, %c0_89, %c0_90] : memref<2x2x8x1xf32, #tpu.memory_space<vmem>>, vector<1x1x8x1xf32>
    %176 = vector.shape_cast %175 : vector<1x1x8x1xf32> to vector<8x1xf32>
    %177 = vector.broadcast %176 : vector<8x1xf32> to vector<8x128xf32>
    %178 = arith.addf %174, %177 : vector<8x128xf32>
    %cst_91 = arith.constant 0.000000e+00 : f32
    %179 = vector.broadcast %cst_91 : f32 to vector<8x128xf32>
    %180 = arith.maximumf %178, %179 : vector<8x128xf32>
    %c0_92 = arith.constant 0 : index
    %c0_93 = arith.constant 0 : index
    %c0_94 = arith.constant 0 : index
    %c0_95 = arith.constant 0 : index
    %181 = vector.load %arg12[%c0_92, %c0_93, %c0_94, %c0_95] : memref<2x2x8x8xbf16, #tpu.memory_space<vmem>>, vector<1x1x8x8xbf16>
    %182 = vector.shape_cast %181 : vector<1x1x8x8xbf16> to vector<8x8xbf16>
    %183 = arith.truncf %180 : vector<8x128xf32> to vector<8x128xbf16>
    %cst_96 = arith.constant dense<0.000000e+00> : vector<8x128xf32>
    %184 = tpu.matmul %182, %183, %cst_96 {dimension_numbers = #tpu.dot_dimension_numbers<[1], [0], [0], [1], [0, 0, 1, 1], [], []>} : vector<8x8xbf16>, vector<8x128xbf16>, vector<8x128xf32> -> vector<8x128xf32>
    %185 = arith.addf %155, %184 : vector<8x128xf32>
    %c0_97 = arith.constant 0 : index
    %c0_98 = arith.constant 0 : index
    %c0_99 = arith.constant 0 : index
    %c0_100 = arith.constant 0 : index
    %186 = vector.load %arg13[%c0_97, %c0_98, %c0_99, %c0_100] : memref<2x2x8x1xf32, #tpu.memory_space<vmem>>, vector<1x1x8x1xf32>
    %187 = vector.shape_cast %186 : vector<1x1x8x1xf32> to vector<8x1xf32>
    %188 = vector.broadcast %187 : vector<8x1xf32> to vector<8x128xf32>
    %189 = arith.addf %185, %188 : vector<8x128xf32>
    %c2_i32_101 = arith.constant 2 : i32
    %190 = vector.broadcast %c2_i32_101 : i32 to vector<1x128xi32>
    %191 = arith.cmpi sge, %0, %190 : vector<1x128xi32>
    %c2_i32_102 = arith.constant 2 : i32
    %192 = tpu.dynamic_rotate %189 by %c2_i32_102 dim 1 : vector<8x128xf32>, i32 -> vector<8x128xf32>
    %cst_103 = arith.constant 0.000000e+00 : f32
    %193 = vector.shape_cast %191 : vector<1x128xi1> to vector<1x128xi1>
    %194 = vector.broadcast %193 : vector<1x128xi1> to vector<8x128xi1>
    %195 = vector.broadcast %cst_103 : f32 to vector<8x128xf32>
    %196 = arith.select %194, %192, %195 : vector<8x128xi1>, vector<8x128xf32>
    %c126_i32_104 = arith.constant 126 : i32
    %197 = vector.broadcast %c126_i32_104 : i32 to vector<1x128xi32>
    %198 = arith.cmpi slt, %0, %197 : vector<1x128xi32>
    %c126_i32_105 = arith.constant 126 : i32
    %199 = tpu.dynamic_rotate %189 by %c126_i32_105 dim 1 : vector<8x128xf32>, i32 -> vector<8x128xf32>
    %cst_106 = arith.constant 0.000000e+00 : f32
    %200 = vector.shape_cast %198 : vector<1x128xi1> to vector<1x128xi1>
    %201 = vector.broadcast %200 : vector<1x128xi1> to vector<8x128xi1>
    %202 = vector.broadcast %cst_106 : f32 to vector<8x128xf32>
    %203 = arith.select %201, %199, %202 : vector<8x128xi1>, vector<8x128xf32>
    %204 = tpu.concatenate %196, %189, %203 in 0 : vector<8x128xf32>, vector<8x128xf32>, vector<8x128xf32> -> vector<24x128xf32>
    %c0_107 = arith.constant 0 : index
    %c1_108 = arith.constant 1 : index
    %c0_109 = arith.constant 0 : index
    %c0_110 = arith.constant 0 : index
    %205 = vector.load %arg10[%c0_107, %c1_108, %c0_109, %c0_110] : memref<2x2x8x24xbf16, #tpu.memory_space<vmem>>, vector<1x1x8x24xbf16>
    %206 = vector.shape_cast %205 : vector<1x1x8x24xbf16> to vector<8x24xbf16>
    %207 = arith.truncf %204 : vector<24x128xf32> to vector<24x128xbf16>
    %cst_111 = arith.constant dense<0.000000e+00> : vector<8x128xf32>
    %208 = tpu.matmul %206, %207, %cst_111 {dimension_numbers = #tpu.dot_dimension_numbers<[1], [0], [0], [1], [0, 0, 1, 1], [], []>} : vector<8x24xbf16>, vector<24x128xbf16>, vector<8x128xf32> -> vector<8x128xf32>
    %c0_112 = arith.constant 0 : index
    %c1_113 = arith.constant 1 : index
    %c0_114 = arith.constant 0 : index
    %c0_115 = arith.constant 0 : index
    %209 = vector.load %arg11[%c0_112, %c1_113, %c0_114, %c0_115] : memref<2x2x8x1xf32, #tpu.memory_space<vmem>>, vector<1x1x8x1xf32>
    %210 = vector.shape_cast %209 : vector<1x1x8x1xf32> to vector<8x1xf32>
    %211 = vector.broadcast %210 : vector<8x1xf32> to vector<8x128xf32>
    %212 = arith.addf %208, %211 : vector<8x128xf32>
    %cst_116 = arith.constant 0.000000e+00 : f32
    %213 = vector.broadcast %cst_116 : f32 to vector<8x128xf32>
    %214 = arith.maximumf %212, %213 : vector<8x128xf32>
    %c0_117 = arith.constant 0 : index
    %c1_118 = arith.constant 1 : index
    %c0_119 = arith.constant 0 : index
    %c0_120 = arith.constant 0 : index
    %215 = vector.load %arg12[%c0_117, %c1_118, %c0_119, %c0_120] : memref<2x2x8x8xbf16, #tpu.memory_space<vmem>>, vector<1x1x8x8xbf16>
    %216 = vector.shape_cast %215 : vector<1x1x8x8xbf16> to vector<8x8xbf16>
    %217 = arith.truncf %214 : vector<8x128xf32> to vector<8x128xbf16>
    %cst_121 = arith.constant dense<0.000000e+00> : vector<8x128xf32>
    %218 = tpu.matmul %216, %217, %cst_121 {dimension_numbers = #tpu.dot_dimension_numbers<[1], [0], [0], [1], [0, 0, 1, 1], [], []>} : vector<8x8xbf16>, vector<8x128xbf16>, vector<8x128xf32> -> vector<8x128xf32>
    %219 = arith.addf %189, %218 : vector<8x128xf32>
    %c0_122 = arith.constant 0 : index
    %c1_123 = arith.constant 1 : index
    %c0_124 = arith.constant 0 : index
    %c0_125 = arith.constant 0 : index
    %220 = vector.load %arg13[%c0_122, %c1_123, %c0_124, %c0_125] : memref<2x2x8x1xf32, #tpu.memory_space<vmem>>, vector<1x1x8x1xf32>
    %221 = vector.shape_cast %220 : vector<1x1x8x1xf32> to vector<8x1xf32>
    %222 = vector.broadcast %221 : vector<8x1xf32> to vector<8x128xf32>
    %223 = arith.addf %219, %222 : vector<8x128xf32>
    %c0_126 = arith.constant 0 : index
    %c0_127 = arith.constant 0 : index
    %c0_128 = arith.constant 0 : index
    %224 = vector.load %arg14[%c0_126, %c0_127, %c0_128] : memref<2x6x8xbf16, #tpu.memory_space<vmem>>, vector<1x6x8xbf16>
    %225 = vector.shape_cast %224 : vector<1x6x8xbf16> to vector<6x8xbf16>
    %226 = arith.truncf %223 : vector<8x128xf32> to vector<8x128xbf16>
    %cst_129 = arith.constant dense<0.000000e+00> : vector<6x128xf32>
    %227 = tpu.matmul %225, %226, %cst_129 {dimension_numbers = #tpu.dot_dimension_numbers<[1], [0], [0], [1], [0, 0, 1, 1], [], []>} : vector<6x8xbf16>, vector<8x128xbf16>, vector<6x128xf32> -> vector<6x128xf32>
    %c0_130 = arith.constant 0 : index
    %c0_131 = arith.constant 0 : index
    %c0_132 = arith.constant 0 : index
    %228 = vector.load %arg15[%c0_130, %c0_131, %c0_132] : memref<2x6x1xf32, #tpu.memory_space<vmem>>, vector<1x6x1xf32>
    %229 = vector.shape_cast %228 : vector<1x6x1xf32> to vector<6x1xf32>
    %230 = vector.broadcast %229 : vector<6x1xf32> to vector<6x128xf32>
    %231 = arith.addf %227, %230 : vector<6x128xf32>
    %c1_133 = arith.constant 1 : index
    %c0_134 = arith.constant 0 : index
    %c0_135 = arith.constant 0 : index
    %c0_136 = arith.constant 0 : index
    %232 = vector.load %arg16[%c1_133, %c0_134, %c0_135, %c0_136] : memref<3x1x6x128xf32, #tpu.memory_space<vmem>>, vector<1x1x6x128xf32>
    %233 = vector.shape_cast %232 : vector<1x1x6x128xf32> to vector<6x128xf32>
    %234 = vector.shape_cast %231 : vector<6x128xf32> to vector<1x1x6x128xf32>
    tpu.vector_store %arg16[%c1_133, %c0_134, %c0_135, %c0_136], %234 {strides = array<i32>} : memref<3x1x6x128xf32, #tpu.memory_space<vmem>>, vector<1x1x6x128xf32>,
    %cst_137 = arith.constant dense<0xFF800000> : vector<128xf32>
    %235 = vector.multi_reduction <maximumf>, %231, %cst_137 [0] : vector<6x128xf32> to vector<128xf32>
    %236 = vector.shape_cast %235 : vector<128xf32> to vector<1x128xf32>
    %237 = vector.broadcast %236 : vector<1x128xf32> to vector<6x128xf32>
    %238 = arith.subf %231, %237 : vector<6x128xf32>
    %239 = math.exp %238 : vector<6x128xf32>
    %cst_138 = arith.constant dense<0.000000e+00> : vector<128xf32>
    %240 = vector.multi_reduction <add>, %239, %cst_138 [0] : vector<6x128xf32> to vector<128xf32>
    %241 = vector.shape_cast %240 : vector<128xf32> to vector<1x128xf32>
    %242 = tpu.reciprocal %241 {approx = true} : vector<1x128xf32> -> vector<1x128xf32>
    %243 = vector.broadcast %242 : vector<1x128xf32> to vector<6x128xf32>
    %244 = arith.mulf %239, %243 : vector<6x128xf32>
    %c1_139 = arith.constant 1 : index
    %c0_140 = arith.constant 0 : index
    %c0_141 = arith.constant 0 : index
    %245 = vector.load %arg8[%c1_139, %c0_140, %c0_141] : memref<2x8x6xbf16, #tpu.memory_space<vmem>>, vector<1x8x6xbf16>
    %246 = vector.shape_cast %245 : vector<1x8x6xbf16> to vector<8x6xbf16>
    %247 = arith.truncf %244 : vector<6x128xf32> to vector<6x128xbf16>
    %cst_142 = arith.constant dense<0.000000e+00> : vector<8x128xf32>
    %248 = tpu.matmul %246, %247, %cst_142 {dimension_numbers = #tpu.dot_dimension_numbers<[1], [0], [0], [1], [0, 0, 1, 1], [], []>} : vector<8x6xbf16>, vector<6x128xbf16>, vector<8x128xf32> -> vector<8x128xf32>
    %c1_143 = arith.constant 1 : index
    %c0_144 = arith.constant 0 : index
    %c0_145 = arith.constant 0 : index
    %249 = vector.load %arg9[%c1_143, %c0_144, %c0_145] : memref<2x8x1xf32, #tpu.memory_space<vmem>>, vector<1x8x1xf32>
    %250 = vector.shape_cast %249 : vector<1x8x1xf32> to vector<8x1xf32>
    %251 = vector.broadcast %250 : vector<8x1xf32> to vector<8x128xf32>
    %252 = arith.addf %248, %251 : vector<8x128xf32>
    %c1_i32_146 = arith.constant 1 : i32
    %253 = vector.broadcast %c1_i32_146 : i32 to vector<1x128xi32>
    %254 = arith.cmpi sge, %0, %253 : vector<1x128xi32>
    %c1_i32_147 = arith.constant 1 : i32
    %255 = tpu.dynamic_rotate %252 by %c1_i32_147 dim 1 : vector<8x128xf32>, i32 -> vector<8x128xf32>
    %cst_148 = arith.constant 0.000000e+00 : f32
    %256 = vector.shape_cast %254 : vector<1x128xi1> to vector<1x128xi1>
    %257 = vector.broadcast %256 : vector<1x128xi1> to vector<8x128xi1>
    %258 = vector.broadcast %cst_148 : f32 to vector<8x128xf32>
    %259 = arith.select %257, %255, %258 : vector<8x128xi1>, vector<8x128xf32>
    %c127_i32_149 = arith.constant 127 : i32
    %260 = vector.broadcast %c127_i32_149 : i32 to vector<1x128xi32>
    %261 = arith.cmpi slt, %0, %260 : vector<1x128xi32>
    %c127_i32_150 = arith.constant 127 : i32
    %262 = tpu.dynamic_rotate %252 by %c127_i32_150 dim 1 : vector<8x128xf32>, i32 -> vector<8x128xf32>
    %cst_151 = arith.constant 0.000000e+00 : f32
    %263 = vector.shape_cast %261 : vector<1x128xi1> to vector<1x128xi1>
    %264 = vector.broadcast %263 : vector<1x128xi1> to vector<8x128xi1>
    %265 = vector.broadcast %cst_151 : f32 to vector<8x128xf32>
    %266 = arith.select %264, %262, %265 : vector<8x128xi1>, vector<8x128xf32>
    %267 = tpu.concatenate %259, %252, %266 in 0 : vector<8x128xf32>, vector<8x128xf32>, vector<8x128xf32> -> vector<24x128xf32>
    %c1_152 = arith.constant 1 : index
    %c0_153 = arith.constant 0 : index
    %c0_154 = arith.constant 0 : index
    %c0_155 = arith.constant 0 : index
    %268 = vector.load %arg10[%c1_152, %c0_153, %c0_154, %c0_155] : memref<2x2x8x24xbf16, #tpu.memory_space<vmem>>, vector<1x1x8x24xbf16>
    %269 = vector.shape_cast %268 : vector<1x1x8x24xbf16> to vector<8x24xbf16>
    %270 = arith.truncf %267 : vector<24x128xf32> to vector<24x128xbf16>
    %cst_156 = arith.constant dense<0.000000e+00> : vector<8x128xf32>
    %271 = tpu.matmul %269, %270, %cst_156 {dimension_numbers = #tpu.dot_dimension_numbers<[1], [0], [0], [1], [0, 0, 1, 1], [], []>} : vector<8x24xbf16>, vector<24x128xbf16>, vector<8x128xf32> -> vector<8x128xf32>
    %c1_157 = arith.constant 1 : index
    %c0_158 = arith.constant 0 : index
    %c0_159 = arith.constant 0 : index
    %c0_160 = arith.constant 0 : index
    %272 = vector.load %arg11[%c1_157, %c0_158, %c0_159, %c0_160] : memref<2x2x8x1xf32, #tpu.memory_space<vmem>>, vector<1x1x8x1xf32>
    %273 = vector.shape_cast %272 : vector<1x1x8x1xf32> to vector<8x1xf32>
    %274 = vector.broadcast %273 : vector<8x1xf32> to vector<8x128xf32>
    %275 = arith.addf %271, %274 : vector<8x128xf32>
    %cst_161 = arith.constant 0.000000e+00 : f32
    %276 = vector.broadcast %cst_161 : f32 to vector<8x128xf32>
    %277 = arith.maximumf %275, %276 : vector<8x128xf32>
    %c1_162 = arith.constant 1 : index
    %c0_163 = arith.constant 0 : index
    %c0_164 = arith.constant 0 : index
    %c0_165 = arith.constant 0 : index
    %278 = vector.load %arg12[%c1_162, %c0_163, %c0_164, %c0_165] : memref<2x2x8x8xbf16, #tpu.memory_space<vmem>>, vector<1x1x8x8xbf16>
    %279 = vector.shape_cast %278 : vector<1x1x8x8xbf16> to vector<8x8xbf16>
    %280 = arith.truncf %277 : vector<8x128xf32> to vector<8x128xbf16>
    %cst_166 = arith.constant dense<0.000000e+00> : vector<8x128xf32>
    %281 = tpu.matmul %279, %280, %cst_166 {dimension_numbers = #tpu.dot_dimension_numbers<[1], [0], [0], [1], [0, 0, 1, 1], [], []>} : vector<8x8xbf16>, vector<8x128xbf16>, vector<8x128xf32> -> vector<8x128xf32>
    %282 = arith.addf %252, %281 : vector<8x128xf32>
    %c1_167 = arith.constant 1 : index
    %c0_168 = arith.constant 0 : index
    %c0_169 = arith.constant 0 : index
    %c0_170 = arith.constant 0 : index
    %283 = vector.load %arg13[%c1_167, %c0_168, %c0_169, %c0_170] : memref<2x2x8x1xf32, #tpu.memory_space<vmem>>, vector<1x1x8x1xf32>
    %284 = vector.shape_cast %283 : vector<1x1x8x1xf32> to vector<8x1xf32>
    %285 = vector.broadcast %284 : vector<8x1xf32> to vector<8x128xf32>
    %286 = arith.addf %282, %285 : vector<8x128xf32>
    %c2_i32_171 = arith.constant 2 : i32
    %287 = vector.broadcast %c2_i32_171 : i32 to vector<1x128xi32>
    %288 = arith.cmpi sge, %0, %287 : vector<1x128xi32>
    %c2_i32_172 = arith.constant 2 : i32
    %289 = tpu.dynamic_rotate %286 by %c2_i32_172 dim 1 : vector<8x128xf32>, i32 -> vector<8x128xf32>
    %cst_173 = arith.constant 0.000000e+00 : f32
    %290 = vector.shape_cast %288 : vector<1x128xi1> to vector<1x128xi1>
    %291 = vector.broadcast %290 : vector<1x128xi1> to vector<8x128xi1>
    %292 = vector.broadcast %cst_173 : f32 to vector<8x128xf32>
    %293 = arith.select %291, %289, %292 : vector<8x128xi1>, vector<8x128xf32>
    %c126_i32_174 = arith.constant 126 : i32
    %294 = vector.broadcast %c126_i32_174 : i32 to vector<1x128xi32>
    %295 = arith.cmpi slt, %0, %294 : vector<1x128xi32>
    %c126_i32_175 = arith.constant 126 : i32
    %296 = tpu.dynamic_rotate %286 by %c126_i32_175 dim 1 : vector<8x128xf32>, i32 -> vector<8x128xf32>
    %cst_176 = arith.constant 0.000000e+00 : f32
    %297 = vector.shape_cast %295 : vector<1x128xi1> to vector<1x128xi1>
    %298 = vector.broadcast %297 : vector<1x128xi1> to vector<8x128xi1>
    %299 = vector.broadcast %cst_176 : f32 to vector<8x128xf32>
    %300 = arith.select %298, %296, %299 : vector<8x128xi1>, vector<8x128xf32>
    %301 = tpu.concatenate %293, %286, %300 in 0 : vector<8x128xf32>, vector<8x128xf32>, vector<8x128xf32> -> vector<24x128xf32>
    %c1_177 = arith.constant 1 : index
    %c1_178 = arith.constant 1 : index
    %c0_179 = arith.constant 0 : index
    %c0_180 = arith.constant 0 : index
    %302 = vector.load %arg10[%c1_177, %c1_178, %c0_179, %c0_180] : memref<2x2x8x24xbf16, #tpu.memory_space<vmem>>, vector<1x1x8x24xbf16>
    %303 = vector.shape_cast %302 : vector<1x1x8x24xbf16> to vector<8x24xbf16>
    %304 = arith.truncf %301 : vector<24x128xf32> to vector<24x128xbf16>
    %cst_181 = arith.constant dense<0.000000e+00> : vector<8x128xf32>
    %305 = tpu.matmul %303, %304, %cst_181 {dimension_numbers = #tpu.dot_dimension_numbers<[1], [0], [0], [1], [0, 0, 1, 1], [], []>} : vector<8x24xbf16>, vector<24x128xbf16>, vector<8x128xf32> -> vector<8x128xf32>
    %c1_182 = arith.constant 1 : index
    %c1_183 = arith.constant 1 : index
    %c0_184 = arith.constant 0 : index
    %c0_185 = arith.constant 0 : index
    %306 = vector.load %arg11[%c1_182, %c1_183, %c0_184, %c0_185] : memref<2x2x8x1xf32, #tpu.memory_space<vmem>>, vector<1x1x8x1xf32>
    %307 = vector.shape_cast %306 : vector<1x1x8x1xf32> to vector<8x1xf32>
    %308 = vector.broadcast %307 : vector<8x1xf32> to vector<8x128xf32>
    %309 = arith.addf %305, %308 : vector<8x128xf32>
    %cst_186 = arith.constant 0.000000e+00 : f32
    %310 = vector.broadcast %cst_186 : f32 to vector<8x128xf32>
    %311 = arith.maximumf %309, %310 : vector<8x128xf32>
    %c1_187 = arith.constant 1 : index
    %c1_188 = arith.constant 1 : index
    %c0_189 = arith.constant 0 : index
    %c0_190 = arith.constant 0 : index
    %312 = vector.load %arg12[%c1_187, %c1_188, %c0_189, %c0_190] : memref<2x2x8x8xbf16, #tpu.memory_space<vmem>>, vector<1x1x8x8xbf16>
    %313 = vector.shape_cast %312 : vector<1x1x8x8xbf16> to vector<8x8xbf16>
    %314 = arith.truncf %311 : vector<8x128xf32> to vector<8x128xbf16>
    %cst_191 = arith.constant dense<0.000000e+00> : vector<8x128xf32>
    %315 = tpu.matmul %313, %314, %cst_191 {dimension_numbers = #tpu.dot_dimension_numbers<[1], [0], [0], [1], [0, 0, 1, 1], [], []>} : vector<8x8xbf16>, vector<8x128xbf16>, vector<8x128xf32> -> vector<8x128xf32>
    %316 = arith.addf %286, %315 : vector<8x128xf32>
    %c1_192 = arith.constant 1 : index
    %c1_193 = arith.constant 1 : index
    %c0_194 = arith.constant 0 : index
    %c0_195 = arith.constant 0 : index
    %317 = vector.load %arg13[%c1_192, %c1_193, %c0_194, %c0_195] : memref<2x2x8x1xf32, #tpu.memory_space<vmem>>, vector<1x1x8x1xf32>
    %318 = vector.shape_cast %317 : vector<1x1x8x1xf32> to vector<8x1xf32>
    %319 = vector.broadcast %318 : vector<8x1xf32> to vector<8x128xf32>
    %320 = arith.addf %316, %319 : vector<8x128xf32>
    %c1_196 = arith.constant 1 : index
    %c0_197 = arith.constant 0 : index
    %c0_198 = arith.constant 0 : index
    %321 = vector.load %arg14[%c1_196, %c0_197, %c0_198] : memref<2x6x8xbf16, #tpu.memory_space<vmem>>, vector<1x6x8xbf16>
    %322 = vector.shape_cast %321 : vector<1x6x8xbf16> to vector<6x8xbf16>
    %323 = arith.truncf %320 : vector<8x128xf32> to vector<8x128xbf16>
    %cst_199 = arith.constant dense<0.000000e+00> : vector<6x128xf32>
    %324 = tpu.matmul %322, %323, %cst_199 {dimension_numbers = #tpu.dot_dimension_numbers<[1], [0], [0], [1], [0, 0, 1, 1], [], []>} : vector<6x8xbf16>, vector<8x128xbf16>, vector<6x128xf32> -> vector<6x128xf32>
    %c1_200 = arith.constant 1 : index
    %c0_201 = arith.constant 0 : index
    %c0_202 = arith.constant 0 : index
    %325 = vector.load %arg15[%c1_200, %c0_201, %c0_202] : memref<2x6x1xf32, #tpu.memory_space<vmem>>, vector<1x6x1xf32>
    %326 = vector.shape_cast %325 : vector<1x6x1xf32> to vector<6x1xf32>
    %327 = vector.broadcast %326 : vector<6x1xf32> to vector<6x128xf32>
    %328 = arith.addf %324, %327 : vector<6x128xf32>
    %c2_203 = arith.constant 2 : index
    %c0_204 = arith.constant 0 : index
    %c0_205 = arith.constant 0 : index
    %c0_206 = arith.constant 0 : index
    %329 = vector.load %arg16[%c2_203, %c0_204, %c0_205, %c0_206] : memref<3x1x6x128xf32, #tpu.memory_space<vmem>>, vector<1x1x6x128xf32>
    %330 = vector.shape_cast %329 : vector<1x1x6x128xf32> to vector<6x128xf32>
    %331 = vector.shape_cast %328 : vector<6x128xf32> to vector<1x1x6x128xf32>
    tpu.vector_store %arg16[%c2_203, %c0_204, %c0_205, %c0_206], %331 {strides = array<i32>} : memref<3x1x6x128xf32, #tpu.memory_space<vmem>>, vector<1x1x6x128xf32>,
    return
  }
  func.func @transform_0(%arg0: i32) -> (i32, i32, i32) {
    %c0_i32 = arith.constant 0 : i32
    %c0_i32_0 = arith.constant 0 : i32
    %c0_i32_1 = arith.constant 0 : i32
    return %arg0, %c0_i32, %c0_i32_0 : i32, i32, i32
  }
  func.func @transform_1(%arg0: i32) -> (i32, i32) {
    %c0_i32 = arith.constant 0 : i32
    %c0_i32_0 = arith.constant 0 : i32
    %c0_i32_1 = arith.constant 0 : i32
    return %c0_i32, %c0_i32_0 : i32, i32
  }
  func.func @transform_2(%arg0: i32) -> (i32, i32) {
    %c0_i32 = arith.constant 0 : i32
    %c0_i32_0 = arith.constant 0 : i32
    %c0_i32_1 = arith.constant 0 : i32
    return %c0_i32, %c0_i32_0 : i32, i32
  }
  func.func @transform_3(%arg0: i32) -> (i32, i32, i32) {
    %c0_i32 = arith.constant 0 : i32
    %c0_i32_0 = arith.constant 0 : i32
    %c0_i32_1 = arith.constant 0 : i32
    %c0_i32_2 = arith.constant 0 : i32
    return %c0_i32, %c0_i32_0, %c0_i32_1 : i32, i32, i32
  }
  func.func @transform_4(%arg0: i32) -> (i32, i32, i32) {
    %c0_i32 = arith.constant 0 : i32
    %c0_i32_0 = arith.constant 0 : i32
    %c0_i32_1 = arith.constant 0 : i32
    %c0_i32_2 = arith.constant 0 : i32
    return %c0_i32, %c0_i32_0, %c0_i32_1 : i32, i32, i32
  }
  func.func @transform_5(%arg0: i32) -> (i32, i32) {
    %c0_i32 = arith.constant 0 : i32
    %c0_i32_0 = arith.constant 0 : i32
    %c0_i32_1 = arith.constant 0 : i32
    return %c0_i32, %c0_i32_0 : i32, i32
  }
  func.func @transform_6(%arg0: i32) -> (i32, i32) {
    %c0_i32 = arith.constant 0 : i32
    %c0_i32_0 = arith.constant 0 : i32
    %c0_i32_1 = arith.constant 0 : i32
    return %c0_i32, %c0_i32_0 : i32, i32
  }
  func.func @transform_7(%arg0: i32) -> (i32, i32, i32) {
    %c0_i32 = arith.constant 0 : i32
    %c0_i32_0 = arith.constant 0 : i32
    %c0_i32_1 = arith.constant 0 : i32
    %c0_i32_2 = arith.constant 0 : i32
    return %c0_i32, %c0_i32_0, %c0_i32_1 : i32, i32, i32
  }
  func.func @transform_8(%arg0: i32) -> (i32, i32, i32) {
    %c0_i32 = arith.constant 0 : i32
    %c0_i32_0 = arith.constant 0 : i32
    %c0_i32_1 = arith.constant 0 : i32
    %c0_i32_2 = arith.constant 0 : i32
    return %c0_i32, %c0_i32_0, %c0_i32_1 : i32, i32, i32
  }
  func.func @transform_9(%arg0: i32) -> (i32, i32, i32, i32) {
    %c0_i32 = arith.constant 0 : i32
    %c0_i32_0 = arith.constant 0 : i32
    %c0_i32_1 = arith.constant 0 : i32
    %c0_i32_2 = arith.constant 0 : i32
    %c0_i32_3 = arith.constant 0 : i32
    return %c0_i32, %c0_i32_0, %c0_i32_1, %c0_i32_2 : i32, i32, i32, i32
  }
  func.func @transform_10(%arg0: i32) -> (i32, i32, i32, i32) {
    %c0_i32 = arith.constant 0 : i32
    %c0_i32_0 = arith.constant 0 : i32
    %c0_i32_1 = arith.constant 0 : i32
    %c0_i32_2 = arith.constant 0 : i32
    %c0_i32_3 = arith.constant 0 : i32
    return %c0_i32, %c0_i32_0, %c0_i32_1, %c0_i32_2 : i32, i32, i32, i32
  }
  func.func @transform_11(%arg0: i32) -> (i32, i32, i32, i32) {
    %c0_i32 = arith.constant 0 : i32
    %c0_i32_0 = arith.constant 0 : i32
    %c0_i32_1 = arith.constant 0 : i32
    %c0_i32_2 = arith.constant 0 : i32
    %c0_i32_3 = arith.constant 0 : i32
    return %c0_i32, %c0_i32_0, %c0_i32_1, %c0_i32_2 : i32, i32, i32, i32
  }
  func.func @transform_12(%arg0: i32) -> (i32, i32, i32, i32) {
    %c0_i32 = arith.constant 0 : i32
    %c0_i32_0 = arith.constant 0 : i32
    %c0_i32_1 = arith.constant 0 : i32
    %c0_i32_2 = arith.constant 0 : i32
    %c0_i32_3 = arith.constant 0 : i32
    return %c0_i32, %c0_i32_0, %c0_i32_1, %c0_i32_2 : i32, i32, i32, i32
  }
  func.func @transform_13(%arg0: i32) -> (i32, i32, i32) {
    %c0_i32 = arith.constant 0 : i32
    %c0_i32_0 = arith.constant 0 : i32
    %c0_i32_1 = arith.constant 0 : i32
    %c0_i32_2 = arith.constant 0 : i32
    return %c0_i32, %c0_i32_0, %c0_i32_1 : i32, i32, i32
  }
  func.func @transform_14(%arg0: i32) -> (i32, i32, i32) {
    %c0_i32 = arith.constant 0 : i32
    %c0_i32_0 = arith.constant 0 : i32
    %c0_i32_1 = arith.constant 0 : i32
    %c0_i32_2 = arith.constant 0 : i32
    return %c0_i32, %c0_i32_0, %c0_i32_1 : i32, i32, i32
  }
  func.func @transform_15(%arg0: i32) -> (i32, i32, i32, i32) {
    %c0_i32 = arith.constant 0 : i32
    %c0_i32_0 = arith.constant 0 : i32
    %c0_i32_1 = arith.constant 0 : i32
    %c0_i32_2 = arith.constant 0 : i32
    return %c0_i32, %arg0, %c0_i32_0, %c0_i32_1 : i32, i32, i32, i32
  }
}

</mosaic_0001>

<bundles_post_ra>
// kernel: ms_tcn2_forward.1
= control target key start
LH: loop header
LB: loop body
LE: loop exit
PB: predicated region body
PF: predicated region fallthrough
CT: control target
= control target key end

     0   :  { %s2417_s0 = inlined_call_operand.vmem [shape: f32[2,8,128], index: 0, kind: input, shape index: {}]   ;;  %s2418_s1 = inlined_call_operand.vmem [shape: bf16[8,8], index: 1, kind: input, shape index: {}]   ;;  %s2419_s2 = inlined_call_operand.vmem [shape: f32[8,1], index: 2, kind: input, shape index: {}]   ;;  %s2420_s3 = inlined_call_operand.vmem [shape: bf16[3,8,48], index: 3, kind: input, shape index: {}]   ;;  %s2421_s4 = inlined_call_operand.vmem [shape: f32[3,8,1], index: 4, kind: input, shape index: {}]   ;;  %s2422_s5 = inlined_call_operand.vmem [shape: bf16[6,8], index: 5, kind: input, shape index: {}]   ;;  %s2423_s6 = inlined_call_operand.vmem [shape: f32[6,1], index: 6, kind: input, shape index: {}]   ;;  %s2424_s7 = inlined_call_operand.vmem [shape: bf16[2,8,6], index: 7, kind: input, shape index: {}]   ;;  %s2425_s8 = inlined_call_operand.vmem [shape: f32[2,8,1], index: 8, kind: input, shape index: {}]   ;;  %s2426_s9 = inlined_call_operand.vmem [shape: bf16[2,2,8,24], index: 9, kind: input, shape index: {}]   ;;  %s2427_s10 = inlined_call_operand.vmem [shape: f32[2,2,8,1], index: 10, kind: input, shape index: {}]   ;;  %s2428_s11 = inlined_call_operand.vmem [shape: bf16[2,2,8,8], index: 11, kind: input, shape index: {}]   ;;  %s2429_s12 = inlined_call_operand.vmem [shape: f32[2,2,8,1], index: 12, kind: input, shape index: {}]   ;;  %s2430_s13 = inlined_call_operand.vmem [shape: bf16[2,6,8], index: 13, kind: input, shape index: {}]   ;;  %s2431_s14 = inlined_call_operand.vmem [shape: f32[2,6,1], index: 14, kind: input, shape index: {}]   ;;  %s2432_s15 = inlined_call_operand.vmem [shape: f32[3,2,6,128], index: 15, kind: output, shape index: {}]  }
   0x1   :  { %2439 = sst [smem:[#allocation3_spill]] %s2417_s0 }
   0x2   :  { %s2080_s18 = smov 0   ;;  %s2082_s19 = smov 0  }
   0x3   :  { %s2084_s20 = smov 0  }
   0x4 LB: > { %s2093_s21 = sadd.s32 4294967295, %s1988_s20   ;;  %s2095_s22 = sadd.s32 1, %s1988_s20   ;;  %s1988_s20 = sphi %s2084_s20, %s2452_s20   ;;  %s1984_s19 = sphi %s2082_s19, %s2451_s19   ;;  %s1980_s18 = sphi %s2080_s18, %s2450_s18  }
   0x5   : > { %s349_s23 = ssub.s32 %s1988_s20, %s2095_s22  ;;  %s352_s24 = sadd.s32 1, %s1984_s19 }
   0x6   : > { %p350_p0 = scmp.eq.s32.totalorder %s349_s23, 0  ;;  %p362_p1 = scmp.ne.s32.totalorder %s1984_s19, %s1980_s18 }
   0x7   : > { %p363_p2 = scmp.eq.s32.totalorder %s2093_s21, 1  ;;  %p1672_p3 = scmp.ge.s32.totalorder %s1988_s20, 1 }
   0x8   : > { %s2103_s25 = scalar_select %p350_p0, %s1984_s19, %s352_s24  }
   0x9   : > { %p2105_p4 = por %p363_p2, %p362_p1  ;;  %p436_p5 = scmp.lt.s32.totalorder %s1988_s20, 3 }
   0xb   : > { %p437_p6 = pnand %p1672_p3, %p436_p5 }
   0xc   : > { %p482_p7 = scmp.lt.s32.totalorder (!%p437_p6), %s2093_s21, 1  ;;  %v1990_v0 = vmov (!%p437_p6), 0.0   ;;  %vm1991_vm0 = vmmov (!%p437_p6), 0   ;;  %v492_v1 = vld [vmem:[%s2419_s2] sm:$0xff] (!%p437_p6)  ;;  %v1992_v2 = vmov (!%p437_p6), 0   ;;  %s2441_s0 = sld [smem:[#allocation3_spill]] (!%p437_p6)  ;;  %v487_v14 = vlaneseq (!%p437_p6) }
   0xd   : > { %440 = sbr.rel (%p437_p6) target bundleno = 4748 (0x128c), region = 80  ;;  %1799 = vmatprep.subr.bf16.mxu0 (!%p437_p6), %v1990_v0  ;;  %1801 = vmatprep.mubr.msk.bf16.mxu0 (!%p437_p6), %vm1991_vm0, %v1990_v0  ;;  %vm502_vm1 = vcmask (!%p437_p6), 1043456   ;;  %v491_v6 = vld [vmem:[%s2418_s1] sm:$0xf] (!%p437_p6)  ;;  %vm498_vm2 = vcmask (!%p437_p6), 64512   ;;  %s1993_s27 = smov (!%p437_p6), 124  }
   0xe   : > { %1956 = vset.pattern.permute.xlu0 (!%p437_p6), %v1992_v2  ;;  %1805 = vmatprep.subr.bf16.mxu1 (!%p437_p6), %v1990_v0  ;;  %s1994_s28 = smov (!%p437_p6), 4   ;;  %v574_v13 = vld [vmem:[%s2421_s4] sm:$0xff] (!%p437_p6)  ;;  %v2138_v15 = vand.u32 (!%p437_p6), 127, %v487_v14  ;;  %vm1997_vm4 = vmmov (!%p437_p6), 1   ;;  %vm580_vm11 = vcmask (!%p437_p6), 392192   ;;  %s2435_s24 = smov (!%p437_p6), 126  }
   0xf   : > { %495 = vperm.xlu0 (!%p437_p6), %1956, %v492_v1   ;;  %1811 = vmatprep.mubr.msk.bf16.mxu1 (!%p437_p6), %vm1991_vm0, %v1990_v0  ;;  %v570_v23 = vld [vmem:[%s2420_s3] sm:$0xf] (!%p437_p6)  ;;  %s2433_s16 = smov (!%p437_p6), 2   ;;  %v1686_v32 = vld [vmem:[%s2421_s4 + $0x8] sm:$0xff] (!%p437_p6)  ;;  %v1685_v39 = vld [vmem:[%s2420_s3 + $0x4] sm:$0xf] (!%p437_p6) }
  0x10   : > { %1957 = vset.pattern.permute.xlu1 (!%p437_p6), %v1992_v2  ;;  %vm546_vm3 = vcmp.ge.s32.totalorder (!%p437_p6), %v2138_v15, 4  ;;  %vm552_vm6 = vcmp.lt.s32.totalorder (!%p437_p6), %v2138_v15, 124  ;;  %vm558_vm7 = vcmp.ge.s32.totalorder (!%p437_p6), %v2138_v15, 1  ;;  %vm564_vm9 = vcmp.lt.s32.totalorder (!%p437_p6), %v2138_v15, 127  ;;  %v766_v48 = vld [vmem:[%s2423_s6] sm:$0x3f] (!%p437_p6) }
  0x11   : > { %vm1675_vm5 = vmpackc.low (!%p437_p6), %vm1997_vm4, %vm546_vm3  ;;  %vm626_vm12 = vcmp.ge.s32.totalorder (!%p437_p6), %v2138_v15, 2  ;;  %vm632_vm14 = vcmp.lt.s32.totalorder (!%p437_p6), %v2138_v15, 126  ;;  %v1698_v49 = vld [vmem:[%s2421_s4 + $0x10] sm:$0xff] (!%p437_p6)  ;;  %v841_v50 = vld [vmem:[%s2425_s8] sm:$0xff] (!%p437_p6) }
  0x12   : > { %vm1678_vm8 = vmpackc.low (!%p437_p6), %vm558_vm7, %vm552_vm6  ;;  %v1697_v59 = vld [vmem:[%s2420_s3 + $0x8] sm:$0xf] (!%p437_p6) }
  0x13   : > { %vm1681_vm10 = vmpackc.low (!%p437_p6), %vm564_vm9, %vm1997_vm4 }
  0x14   : > { %s483_s29 = scalar_select %p482_p7, %s2093_s21, 1  ;;  %vm2170_vm13 = vmpackc.low %vm1997_vm4, %vm626_vm12 }
  0x15   : > { %vm1690_vm15 = vmpackc.low %vm626_vm12, %vm632_vm14 }
  0x16   : > { %s1673_s30 = sshll.u32 %s483_s29, 3  ;;  %s2437_s29 = smov 1  }
  0x17   : > { %s485_s20 = scalar_lea.vmem %s2441_s0, %s1673_s30  ;;  %s2438_s30 = smov 127  }
  0x18   : > { %v489_v3 = vld [vmem:[%s485_s20] sm:$0xff]  ;;  %s2446_s0 = smov 126  }
  0x19   : > { %v490_v4 = vpack.c.bf16 %v489_v3, %v489_v3 }
  0x1b   : > { %v504_v5 = vsel %vm502_vm1, %v490_v4, 0 }
  0x1c   : > { %1800 = vmatpush3.bf16.msra.mxu0 %v504_v5 }
  0x1d   : > { %1815 = vmatprep.subr.bf16.mxu0 %v1990_v0 }
  0x1f   : > { %1802 = vmatmul.mubr.msk.bf16.vlgmr.msra.gmra.mrb[0].mxu0 %vm498_vm2, %v491_v6 }
  0x20   : > { %1821 = vmatprep.mubr.msk.bf16.mxu0 %vm1991_vm0, %v1990_v0 }
  0x8e   : > { %v496_v7 = vpop.permute.xlu0 %495 }
  0xf2   : > { %v540_v8 = vpop.f32.mrb[0].mxu0 }
  0xf3   : > { %v541_v9 = vadd.f32 %v540_v8, %v496_v7  ;;  %v1803_v10 = vpop.f32.mrb[1].mxu0  ;;  %v764_v7 = vld [vmem:[%s2422_s5] sm:$0x7] }
  0xf4   : > { %v543_v11 = vpop.f32.mrb[2].mxu0 }
  0xf5   : > { %553 = vrot.lane.b32.xlu1 %v541_v9, %s1993_s27  ;;  %547 = vrot.lane.b32.xlu0 %v541_v9, %s1994_s28  ;;  %v1804_v12 = vpop.f32.mrb[3].mxu0 }
  0xf9   : > { %559 = vrot.lane.b32.xlu1 %v541_v9, %s2437_s29  ;;  %565 = vrot.lane.b32.xlu0 %v541_v9, %s2438_s30 }
  0xfd   : > { %577 = vperm.xlu1 %1957, %v574_v13  }
 0x167   : > { %v554_v16 = vpop.permute.xlu1 %553  ;;  %v548_v17 = vpop.permute.xlu0 %547 }
 0x168   : > { %v1676_v18 = vpack.c.bf16 %v541_v9, %v548_v17 }
 0x16a   : > { %1806 = vmatpush3.bf16.msk.msra.mxu1 %vm1675_vm5, %v1676_v18  ;;  %vm1693_vm5 = vmpackc.low %vm632_vm14, %vm1997_vm4 }
 0x16b   : > { %v560_v19 = vpop.permute.xlu1 %559  ;;  %1807 = vmatprep.subr.bf16.mxu1 %v1990_v0  ;;  %v566_v21 = vpop.permute.xlu0 %565 }
 0x16c   : > { %v1679_v20 = vpack.c.bf16 %v560_v19, %v554_v16  ;;  %v1682_v22 = vpack.c.bf16 %v566_v21, %v541_v9 }
 0x16e   : > { %1808 = vmatpush3.bf16.msk.msra.mxu1 %vm1678_vm8, %v1679_v20  ;;  %vm2207_vm8 = vmpackc.low %vm1997_vm4, %vm558_vm7 }
 0x16f   : > { %1809 = vmatprep.subr.bf16.mxu1 %v1990_v0  ;;  %vm1705_vm7 = vmpackc.low %vm552_vm6, %vm1997_vm4  ;;  %vm851_vm4 = vcmask 1042432   ;;  %vm847_vm6 = vcmask 48128  }
 0x172   : > { %1810 = vmatpush3.bf16.msk.msra.mxu1 %vm1681_vm10, %v1682_v22  ;;  %vm1702_vm10 = vmpackc.low %vm546_vm3, %vm564_vm9  ;;  %vm819_vm3 = vcmask 1045504  }
 0x173   : > { %1825 = vmatprep.subr.bf16.mxu1 %v1990_v0 }
 0x175   : > { %1812 = vmatmul.mubr.msk.bf16.vlgmr.msra.gmra.mrb[0].mxu1 %vm580_vm11, %v570_v23 }
 0x176   : > { %1831 = vmatprep.mubr.msk.bf16.mxu1 %vm1991_vm0, %v1990_v0 }
 0x17c   : > { %v578_v24 = vpop.permute.xlu1 %577 }
 0x248   : > { %v618_v25 = vpop.f32.mrb[0].mxu1 }
 0x249   : > { %v619_v26 = vadd.f32 %v618_v25, %v578_v24  ;;  %v1813_v27 = vpop.f32.mrb[1].mxu1 }
 0x24a   : > { %v621_v28 = vpop.f32.mrb[2].mxu1 }
 0x24b   : > { %v624_v29 = vmax.f32 %v619_v26, 0.0  ;;  %v1814_v30 = vpop.f32.mrb[3].mxu1 }
 0x24d   : > { %v625_v31 = vadd.f32 %v624_v29, %v541_v9 }
 0x24f   : > { %633 = vrot.lane.b32.xlu1 %v625_v31, %s2435_s24  ;;  %627 = vrot.lane.b32.xlu0 %v625_v31, %s2433_s16  ;;  %s479_s16 = sand.u32 1, %s1980_s18  }
 0x250   : > { %s1921_s20 = smul.u32 24, %s479_s16  ;;  %s1752_s16 = sshll.u32 (%p2105_p4), %s2093_s21, 3 }
 0x251   : > { %s1577_s17 = scalar_lea.vmem (%p2105_p4), %s2432_s15, %s1752_s16 }
 0x252   : > { %s2239_s23 = scalar_lea.vmem [#allocation2], %s1921_s20 }
 0x253   : > { %647 = vperm.xlu0 %1956, %v1686_v32  }
 0x2c1   : > { %v628_v33 = vpop.permute.xlu0 %627  ;;  %v634_v36 = vpop.permute.xlu1 %633 }
 0x2c2   : > { %v1688_v35 = vpack.c.bf16 %v625_v31, %v628_v33  ;;  %v1691_v37 = vpack.c.bf16 %v628_v33, %v634_v36  ;;  %v1694_v38 = vpack.c.bf16 %v634_v36, %v625_v31 }
 0x2c4   : > { %1816 = vmatpush3.bf16.msk.msra.mxu0 %vm2170_vm13, %v1688_v35 }
 0x2c5   : > { %1817 = vmatprep.subr.bf16.mxu0 %v1990_v0 }
 0x2c8   : > { %1818 = vmatpush3.bf16.msk.msra.mxu0 %vm1690_vm15, %v1691_v37  ;;  %v839_v37 = vld [vmem:[%s2424_s7] sm:$0xf] }
 0x2c9   : > { %1819 = vmatprep.subr.bf16.mxu0 %v1990_v0 }
 0x2cc   : > { %1820 = vmatpush3.bf16.msk.msra.mxu0 %vm1693_vm5, %v1694_v38 }
 0x2cd   : > { %1835 = vmatprep.subr.bf16.mxu0 %v1990_v0 }
 0x2cf   : > { %1822 = vmatmul.mubr.msk.bf16.vlgmr.msra.gmra.mrb[4].mxu0 %vm580_vm11, %v1685_v39 }
 0x2d0   : > { %1837 = vmatprep.mubr.msk.bf16.mxu0 %vm1991_vm0, %v1990_v0 }
 0x2d2   : > { %v648_v40 = vpop.permute.xlu0 %647 }
 0x3a2   : > { %v687_v41 = vpop.f32.mrb[4].mxu0 }
 0x3a3   : > { %v688_v42 = vadd.f32 %v687_v41, %v648_v40  ;;  %v1823_v43 = vpop.f32.mrb[5].mxu0 }
 0x3a4   : > { %v690_v44 = vpop.f32.mrb[6].mxu0 }
 0x3a5   : > { %v693_v45 = vmax.f32 %v688_v42, 0.0  ;;  %v1824_v46 = vpop.f32.mrb[7].mxu0  ;;  %v1007_v44 = vld [vmem:[%s2429_s12] sm:$0xff] }
 0x3a7   : > { %v694_v47 = vadd.f32 %v693_v45, %v625_v31  ;;  %v904_v45 = vld [vmem:[%s2427_s10] sm:$0xff] }
 0x3a9   : > { %698 = vrot.lane.b32.xlu0 %v694_v47, %s2438_s30  ;;  %695 = vrot.lane.b32.xlu1 %v694_v47, %s2437_s29 }
 0x3ad   : > { %704 = vrot.lane.b32.xlu0 %v694_v47, %s1993_s27  ;;  %701 = vrot.lane.b32.xlu1 %v694_v47, %s1994_s28  ;;  %s2447_s27 = smov 2   ;;  %s2448_s28 = smov 127  }
 0x3b1   : > { %769 = vperm.xlu0 %1956, %v766_v48   ;;  %716 = vperm.xlu1 %1957, %v1698_v49  }
 0x3b5   : > { %844 = vperm.xlu1 %1957, %v841_v50  }
 0x41b   : > { %v699_v52 = vpop.permute.xlu0 %698  ;;  %v696_v53 = vpop.permute.xlu1 %695 }
 0x41c   : > { %v1700_v54 = vpack.c.bf16 %v694_v47, %v696_v53  ;;  %v901_v53 = vld [vmem:[%s2426_s9] sm:$0xf] }
 0x41e   : > { %1826 = vmatpush3.bf16.msk.msra.mxu1 %vm2207_vm8, %v1700_v54 }
 0x41f   : > { %v702_v55 = vpop.permute.xlu1 %701  ;;  %1827 = vmatprep.subr.bf16.mxu1 %v1990_v0  ;;  %v705_v57 = vpop.permute.xlu0 %704 }
 0x420   : > { %v1703_v56 = vpack.c.bf16 %v702_v55, %v699_v52  ;;  %v1706_v58 = vpack.c.bf16 %v705_v57, %v694_v47 }
 0x422   : > { %1828 = vmatpush3.bf16.msk.msra.mxu1 %vm1702_vm10, %v1703_v56 }
 0x423   : > { %1829 = vmatprep.subr.bf16.mxu1 %v1990_v0 }
 0x426   : > { %1830 = vmatpush3.bf16.msk.msra.mxu1 %vm1705_vm7, %v1706_v58 }
 0x427   : > { %1847 = vmatprep.subr.bf16.mxu1 %v1990_v0 }
 0x429   : > { %1832 = vmatmul.mubr.msk.bf16.vlgmr.msra.gmra.mrb[4].mxu1 %vm580_vm11, %v1697_v59  ;;  %vm910_vm11 = vcmask 195584  }
 0x42a   : > { %1851 = vmatprep.mubr.msk.bf16.mxu1 %vm1991_vm0, %v1990_v0 }
 0x430   : > { %v717_v60 = vpop.permute.xlu1 %716  ;;  %v770_v8 = vpop.permute.xlu0 %769 }
 0x434   : > { %v845_v38 = vpop.permute.xlu1 %844 }
 0x4fc   : > { %v756_v61 = vpop.f32.mrb[4].mxu1 }
 0x4fd   : > { %v757_v62 = vadd.f32 %v756_v61, %v717_v60  ;;  %v1833_v63 = vpop.f32.mrb[5].mxu1 }
 0x4fe   : > { %v759_v1 = vpop.f32.mrb[6].mxu1  ;;  %v958_v63 = vld [vmem:[%s2428_s11] sm:$0xf] }
 0x4ff   : > { %v762_v2 = vmax.f32 %v757_v62, 0.0  ;;  %v1834_v3 = vpop.f32.mrb[7].mxu1 }
 0x501   : > { %v763_v4 = vadd.f32 %v762_v2, %v694_v47 }
 0x503   : > { %v765_v5 = vpack.c.bf16 %v763_v4, %v763_v4 }
 0x505   : > { %v776_v6 = vsel %vm502_vm1, %v765_v5, 0 }
 0x506   : > { %1836 = vmatpush3.bf16.msra.mxu0 %v776_v6 }
 0x507   : > { %1841 = vmatprep.subr.bf16.mxu0 %v1990_v0 }
 0x509   : > { %1838 = vmatmul.mubr.msk.bf16.vlgmr.msra.gmra.mrb[8].mxu0 %vm498_vm2, %v764_v7 }
 0x50a   : > { %1843 = vmatprep.mubr.msk.bf16.mxu0 %vm1991_vm0, %v1990_v0 }
 0x5dc   : > { %v812_v9 = vpop.f32.mrb[8].mxu0 }
 0x5dd   : > { %v813_v10 = vadd.f32 %v812_v9, %v770_v8  ;;  %v1839_v11 = vpop.f32.mrb[9].mxu0  ;;  %v1724_v8 = vld [vmem:[%s2429_s12 + $0x8] sm:$0xff] }
 0x5de   : > { %v815_v12 = vpop.f32.mrb[10].mxu0  ;;  %v1717_v9 = vld [vmem:[%s2427_s10 + $0x8] sm:$0xff]  ;;  %v1138_v11 = vld [vmem:[%s2431_s14] sm:$0x3f] }
 0x5df   : > { %v820_v13 = vsel %vm819_vm3, %v813_v10, -inf  ;;  %v1840_v14 = vpop.f32.mrb[11].mxu0  ;;  %818 = vst [vmem:[%s2239_s23] sm:$0x3f] %v813_v10 }
 0x5e0   : > { %v821_v16 = vrot.slane %v820_v13, 4 }
 0x5e2   : > { %v822_v17 = vmax.f32 %v820_v13, %v821_v16 }
 0x5e4   : > { %v823_v18 = vrot.slane %v822_v17, 2 }
 0x5e6   : > { %v824_v19 = vmax.f32 %v822_v17, %v823_v18 }
 0x5e8   : > { %v825_v20 = vrot.slane %v824_v19, 1 }
 0x5ea   : > { %v826_v21 = vmax.f32 %v824_v19, %v825_v20  ;;  %v1716_v19 = vld [vmem:[%s2426_s9 + $0x4] sm:$0xf] }
 0x5ec   : > { %v827_v22 = vsub.f32 %v813_v10, %v826_v21  ;;  %v1728_v10 = vld [vmem:[%s2425_s8 + $0x8] sm:$0xff] }
 0x5ee   : > { %v828_v23 = vmul.f32 1.442695, %v827_v22 }
 0x5f0   : > { %1958 = vpow2.f32 %v828_v23 }
 0x5fa   : > { %v1959_v24 = vpop.eup %1958 }
 0x5fb   : > { %v830_v25 = vsel %vm819_vm3, %v1959_v24, 0.0 }
 0x5fc   : > { %v831_v26 = vrot.slane %v830_v25, 4 }
 0x5fe   : > { %v832_v27 = vadd.f32 %v831_v26, %v830_v25 }
 0x600   : > { %v833_v28 = vrot.slane %v832_v27, 2 }
 0x602   : > { %v834_v29 = vadd.f32 %v833_v28, %v832_v27 }
 0x604   : > { %v835_v30 = vrot.slane %v834_v29, 1 }
 0x606   : > { %v836_v31 = vadd.f32 %v835_v30, %v834_v29  ;;  %v1722_v29 = vld [vmem:[%s2428_s11 + $0x4] sm:$0xf] }
 0x608   : > { %1960 = vrcp.f32 %v836_v31 }
 0x612   : > { %v1961_v32 = vpop.eup %1960 }
 0x613   : > { %v838_v33 = vmul.f32 %v1961_v32, %v1959_v24 }
 0x615   : > { %v840_v35 = vpack.c.bf16 %v838_v33, %v838_v33 }
 0x617   : > { %v853_v36 = vsel %vm851_vm4, %v840_v35, 0 }
 0x618   : > { %1842 = vmatpush3.bf16.msra.mxu0 %v853_v36 }
 0x619   : > { %1855 = vmatprep.subr.bf16.mxu0 %v1990_v0 }
 0x61b   : > { %1844 = vmatmul.mubr.msk.bf16.vlgmr.msra.gmra.mrb[12].mxu0 %vm847_vm6, %v839_v37 }
 0x61c   : > { %1857 = vmatprep.mubr.msk.bf16.mxu0 %vm1991_vm0, %v1990_v0 }
 0x6ee   : > { %v889_v39 = vpop.f32.mrb[12].mxu0 }
 0x6ef   : > { %v890_v40 = vadd.f32 %v889_v39, %v845_v38  ;;  %v1845_v41 = vpop.f32.mrb[13].mxu0 }
 0x6f0   : > { %v892_v42 = vpop.f32.mrb[14].mxu0 }
 0x6f1   : > { %898 = vrot.lane.b32.xlu1 %v890_v40, %s2438_s30  ;;  %895 = vrot.lane.b32.xlu0 %v890_v40, %s2437_s29  ;;  %v1846_v43 = vpop.f32.mrb[15].mxu0  ;;  %s2449_s29 = smov 1  }
 0x6f5   : > { %1010 = vperm.xlu1 %1957, %v1007_v44   ;;  %907 = vperm.xlu0 %1956, %v904_v45  }
 0x763   : > { %v899_v46 = vpop.permute.xlu1 %898  ;;  %v896_v47 = vpop.permute.xlu0 %895 }
 0x764   : > { %v900_v48 = vsel %vm564_vm9, %v899_v46, 0.0  ;;  %v1712_v49 = vpack.c.bf16 %v890_v40, %v896_v47 }
 0x765   : > { %v903_v50 = vpack.c.bf16 %v900_v48, %v900_v48 }
 0x766   : > { %1848 = vmatpush3.bf16.msk.msra.mxu1 %vm2207_vm8, %v1712_v49 }
 0x767   : > { %1849 = vmatprep.subr.bf16.mxu1 %v1990_v0  ;;  %v915_v52 = vsel %vm502_vm1, %v903_v50, 0 }
 0x76a   : > { %1850 = vmatpush3.bf16.msra.mxu1 %v915_v52 }
 0x76b   : > { %1861 = vmatprep.subr.bf16.mxu1 %v1990_v0 }
 0x76d   : > { %1852 = vmatmul.mubr.msk.bf16.vlgmr.msra.gmra.mrb[8].mxu1 %vm910_vm11, %v901_v53 }
 0x76e   : > { %1865 = vmatprep.mubr.msk.bf16.mxu1 %vm1991_vm0, %v1990_v0 }
 0x774   : > { %v908_v54 = vpop.permute.xlu0 %907  ;;  %v1011_v4 = vpop.permute.xlu1 %1010 }
 0x840   : > { %v951_v55 = vpop.f32.mrb[8].mxu1 }
 0x841   : > { %v952_v56 = vadd.f32 %v951_v55, %v908_v54  ;;  %v1853_v57 = vpop.f32.mrb[9].mxu1 }
 0x842   : > { %v954_v58 = vpop.f32.mrb[10].mxu1 }
 0x843   : > { %v957_v59 = vmax.f32 %v952_v56, 0.0  ;;  %v1854_v60 = vpop.f32.mrb[11].mxu1 }
 0x845   : > { %v959_v61 = vpack.c.bf16 %v957_v59, %v957_v59 }
 0x847   : > { %v964_v62 = vsel %vm502_vm1, %v959_v61, 0 }
 0x848   : > { %1856 = vmatpush3.bf16.msra.mxu0 %v964_v62 }
 0x849   : > { %1869 = vmatprep.subr.bf16.mxu0 %v1990_v0 }
 0x84b   : > { %1858 = vmatmul.mubr.msk.bf16.vlgmr.msra.gmra.mrb[16].mxu0 %vm498_vm2, %v958_v63 }
 0x84c   : > { %1871 = vmatprep.mubr.msk.bf16.mxu0 %vm1991_vm0, %v1990_v0 }
 0x91e   : > { %v1000_v1 = vpop.f32.mrb[16].mxu0 }
 0x91f   : > { %v1006_v2 = vadd.f32 %v1000_v1, %v890_v40  ;;  %v1859_v3 = vpop.f32.mrb[17].mxu0  ;;  %v1136_v40 = vld [vmem:[%s2430_s13] sm:$0x7] }
 0x920   : > { %v1003_v5 = vpop.f32.mrb[18].mxu0 }
 0x921   : > { %v1013_v6 = vadd.f32 %v1011_v4, %v1006_v2  ;;  %v1860_v7 = vpop.f32.mrb[19].mxu0 }
 0x923   : > { %1017 = vrot.lane.b32.xlu1 %v1013_v6, %s2446_s0  ;;  %1014 = vrot.lane.b32.xlu0 %v1013_v6, %s2447_s27 }
 0x927   : > { %1132 = vperm.xlu1 %1957, %v1724_v8   ;;  %1028 = vperm.xlu0 %1956, %v1717_v9  }
 0x92b   : > { %1218 = vperm.xlu1 %1957, %v1728_v10   ;;  %1141 = vperm.xlu0 %1956, %v1138_v11  }
 0x995   : > { %v1018_v12 = vpop.permute.xlu1 %1017  ;;  %v1015_v13 = vpop.permute.xlu0 %1014 }
 0x996   : > { %v1019_v14 = vsel %vm632_vm14, %v1018_v12, 0.0  ;;  %v1719_v16 = vpack.c.bf16 %v1013_v6, %v1015_v13  ;;  %v1738_v13 = vld [vmem:[%s2429_s12 + $0x10] sm:$0xff] }
 0x997   : > { %v1023_v17 = vpack.c.bf16 %v1019_v14, %v1019_v14  ;;  %v1731_v14 = vld [vmem:[%s2427_s10 + $0x10] sm:$0xff] }
 0x998   : > { %1862 = vmatpush3.bf16.msk.msra.mxu1 %vm2170_vm13, %v1719_v16 }
 0x999   : > { %1863 = vmatprep.subr.bf16.mxu1 %v1990_v0  ;;  %v1035_v18 = vsel %vm502_vm1, %v1023_v17, 0 }
 0x99c   : > { %1864 = vmatpush3.bf16.msra.mxu1 %v1035_v18 }
 0x99d   : > { %1875 = vmatprep.subr.bf16.mxu1 %v1990_v0 }
 0x99f   : > { %1866 = vmatmul.mubr.msk.bf16.vlgmr.msra.gmra.mrb[12].mxu1 %vm910_vm11, %v1716_v19 }
 0x9a0   : > { %1877 = vmatprep.mubr.msk.bf16.mxu1 %vm1991_vm0, %v1990_v0 }
 0x9a6   : > { %v1029_v20 = vpop.permute.xlu0 %1028  ;;  %v1133_v33 = vpop.permute.xlu1 %1132 }
 0x9aa   : > { %v1142_v41 = vpop.permute.xlu0 %1141  ;;  %v1219_v7 = vpop.permute.xlu1 %1218 }
 0xa72   : > { %v1071_v21 = vpop.f32.mrb[12].mxu1 }
 0xa73   : > { %v1072_v22 = vadd.f32 %v1071_v21, %v1029_v20  ;;  %v1867_v23 = vpop.f32.mrb[13].mxu1 }
 0xa74   : > { %v1074_v24 = vpop.f32.mrb[14].mxu1 }
 0xa75   : > { %v1077_v25 = vmax.f32 %v1072_v22, 0.0  ;;  %v1868_v26 = vpop.f32.mrb[15].mxu1  ;;  %v1730_v22 = vld [vmem:[%s2426_s9 + $0x8] sm:$0xf] }
 0xa77   : > { %v1080_v27 = vpack.c.bf16 %v1077_v25, %v1077_v25 }
 0xa79   : > { %v1085_v28 = vsel %vm502_vm1, %v1080_v27, 0 }
 0xa7a   : > { %1870 = vmatpush3.bf16.msra.mxu0 %v1085_v28 }
 0xa7b   : > { %1881 = vmatprep.subr.bf16.mxu0 %v1990_v0 }
 0xa7d   : > { %1872 = vmatmul.mubr.msk.bf16.vlgmr.msra.gmra.mrb[20].mxu0 %vm498_vm2, %v1722_v29 }
 0xa7e   : > { %1883 = vmatprep.mubr.msk.bf16.mxu0 %vm1991_vm0, %v1990_v0 }
 0xb50   : > { %v1121_v30 = vpop.f32.mrb[20].mxu0 }
 0xb51   : > { %v1127_v31 = vadd.f32 %v1121_v30, %v1013_v6  ;;  %v1873_v32 = vpop.f32.mrb[21].mxu0  ;;  %v1727_v6 = vld [vmem:[%s2424_s7 + $0x4] sm:$0xf] }
 0xb52   : > { %v1124_v35 = vpop.f32.mrb[22].mxu0 }
 0xb53   : > { %v1135_v36 = vadd.f32 %v1133_v33, %v1127_v31  ;;  %v1874_v37 = vpop.f32.mrb[23].mxu0  ;;  %v1736_v31 = vld [vmem:[%s2428_s11 + $0x8] sm:$0xf] }
 0xb55   : > { %v1137_v38 = vpack.c.bf16 %v1135_v36, %v1135_v36 }
 0xb57   : > { %v1148_v39 = vsel %vm502_vm1, %v1137_v38, 0 }
 0xb58   : > { %1876 = vmatpush3.bf16.msra.mxu1 %v1148_v39 }
 0xb59   : > { %1887 = vmatprep.subr.bf16.mxu1 %v1990_v0 }
 0xb5b   : > { %1878 = vmatmul.mubr.msk.bf16.vlgmr.msra.gmra.mrb[16].mxu1 %vm498_vm2, %v1136_v40  ;;  %v1747_v40 = vld [vmem:[%s2429_s12 + $0x18] sm:$0xff] }
 0xb5c   : > { %1891 = vmatprep.mubr.msk.bf16.mxu1 %vm1991_vm0, %v1990_v0 }
 0xc2e   : > { %v1184_v42 = vpop.f32.mrb[16].mxu1 }
 0xc2f   : > { %v1185_v43 = vadd.f32 %v1184_v42, %v1142_v41  ;;  %v1879_v44 = vpop.f32.mrb[17].mxu1  ;;  %v1740_v41 = vld [vmem:[%s2427_s10 + $0x18] sm:$0xff]  ;;  %v1749_v42 = vld [vmem:[%s2431_s14 + $0x8] sm:$0x3f] }
 0xc30   : > { %v1187_v45 = vpop.f32.mrb[18].mxu1 }
 0xc31   : > { %v1192_v46 = vsel %vm819_vm3, %v1185_v43, -inf  ;;  %v1880_v47 = vpop.f32.mrb[19].mxu1  ;;  %1726 = vst [vmem:[%s2239_s23 + $0x8] sm:$0x3f] %v1185_v43 }
 0xc32   : > { %v1193_v48 = vrot.slane %v1192_v46, 4 }
 0xc34   : > { %v1194_v49 = vmax.f32 %v1192_v46, %v1193_v48 }
 0xc36   : > { %v1195_v50 = vrot.slane %v1194_v49, 2 }
 0xc38   : > { %v1196_v52 = vmax.f32 %v1194_v49, %v1195_v50  ;;  %v1739_v49 = vld [vmem:[%s2426_s9 + $0xc] sm:$0xf] }
 0xc3a   : > { %v1197_v53 = vrot.slane %v1196_v52, 1 }
 0xc3c   : > { %v1198_v54 = vmax.f32 %v1196_v52, %v1197_v53 }
 0xc3e   : > { %v1199_v55 = vsub.f32 %v1185_v43, %v1198_v54 }
 0xc40   : > { %v1200_v56 = vmul.f32 1.442695, %v1199_v55 }
 0xc42   : > { %1962 = vpow2.f32 %v1200_v56 }
 0xc4c   : > { %v1963_v57 = vpop.eup %1962 }
 0xc4d   : > { %v1202_v58 = vsel %vm819_vm3, %v1963_v57, 0.0 }
 0xc4e   : > { %v1203_v59 = vrot.slane %v1202_v58, 4 }
 0xc50   : > { %v1204_v60 = vadd.f32 %v1203_v59, %v1202_v58  ;;  %v1745_v58 = vld [vmem:[%s2428_s11 + $0xc] sm:$0xf] }
 0xc52   : > { %v1205_v61 = vrot.slane %v1204_v60, 2 }
 0xc54   : > { %v1206_v62 = vadd.f32 %v1205_v61, %v1204_v60 }
 0xc56   : > { %v1207_v63 = vrot.slane %v1206_v62, 1 }
 0xc58   : > { %v1208_v1 = vadd.f32 %v1207_v63, %v1206_v62 }
 0xc5a   : > { %1964 = vrcp.f32 %v1208_v1 }
 0xc64   : > { %v1965_v2 = vpop.eup %1964 }
 0xc65   : > { %v1210_v3 = vmul.f32 %v1965_v2, %v1963_v57 }
 0xc67   : > { %v1213_v4 = vpack.c.bf16 %v1210_v3, %v1210_v3 }
 0xc69   : > { %v1225_v5 = vsel %vm851_vm4, %v1213_v4, 0  ;;  %v1748_v4 = vld [vmem:[%s2430_s13 + $0x4] sm:$0x7] }
 0xc6a   : > { %1882 = vmatpush3.bf16.msra.mxu0 %v1225_v5 }
 0xc6b   : > { %1895 = vmatprep.subr.bf16.mxu0 %v1990_v0 }
 0xc6d   : > { %1884 = vmatmul.mubr.msk.bf16.vlgmr.msra.gmra.mrb[24].mxu0 %vm847_vm6, %v1727_v6 }
 0xc6e   : > { %1897 = vmatprep.mubr.msk.bf16.mxu0 %vm1991_vm0, %v1990_v0 }
 0xd40   : > { %v1261_v8 = vpop.f32.mrb[24].mxu0 }
 0xd41   : > { %v1262_v9 = vadd.f32 %v1261_v8, %v1219_v7  ;;  %v1885_v10 = vpop.f32.mrb[25].mxu0 }
 0xd42   : > { %v1264_v11 = vpop.f32.mrb[26].mxu0 }
 0xd43   : > { %1270 = vrot.lane.b32.xlu1 %v1262_v9, %s2448_s28  ;;  %1267 = vrot.lane.b32.xlu0 %v1262_v9, %s2449_s29  ;;  %v1886_v12 = vpop.f32.mrb[27].mxu0  ;;  %v1609_v11 = vld [vmem:[%s2239_s23] sm:$0xff] (%p2105_p4) }
 0xd44   : > { %v1611_v12 = vld [vmem:[%s2239_s23 + $0x8] sm:$0xff] (%p2105_p4)  ;;  %1610 = vst [vmem:[%s1577_s17] sm:$0xff] (%p2105_p4), %v1609_v11 }
 0xd45   : > { %1612 = vst [vmem:[%s1577_s17 + $0x10] sm:$0xff] (%p2105_p4), %v1611_v12 }
 0xd47   : > { %1385 = vperm.xlu1 %1957, %v1738_v13   ;;  %1281 = vperm.xlu0 %1956, %v1731_v14  }
 0xdb5   : > { %v1271_v16 = vpop.permute.xlu1 %1270  ;;  %v1268_v17 = vpop.permute.xlu0 %1267 }
 0xdb6   : > { %v1272_v18 = vsel %vm564_vm9, %v1271_v16, 0.0  ;;  %v1733_v19 = vpack.c.bf16 %v1262_v9, %v1268_v17 }
 0xdb7   : > { %v1276_v20 = vpack.c.bf16 %v1272_v18, %v1272_v18 }
 0xdb8   : > { %1888 = vmatpush3.bf16.msk.msra.mxu1 %vm2207_vm8, %v1733_v19 }
 0xdb9   : > { %1889 = vmatprep.subr.bf16.mxu1 %v1990_v0  ;;  %v1288_v21 = vsel %vm502_vm1, %v1276_v20, 0 }
 0xdbc   : > { %1890 = vmatpush3.bf16.msra.mxu1 %v1288_v21 }
 0xdbd   : > { %1901 = vmatprep.subr.bf16.mxu1 %v1990_v0 }
 0xdbf   : > { %1892 = vmatmul.mubr.msk.bf16.vlgmr.msra.gmra.mrb[20].mxu1 %vm910_vm11, %v1730_v22 }
 0xdc0   : > { %1905 = vmatprep.mubr.msk.bf16.mxu1 %vm1991_vm0, %v1990_v0 }
 0xdc6   : > { %v1282_v23 = vpop.permute.xlu0 %1281  ;;  %v1386_v36 = vpop.permute.xlu1 %1385 }
 0xe92   : > { %v1324_v24 = vpop.f32.mrb[20].mxu1 }
 0xe93   : > { %v1325_v51 = vadd.f32 %v1324_v24, %v1282_v23  ;;  %v1893_v25 = vpop.f32.mrb[21].mxu1 }
 0xe94   : > { %v1327_v26 = vpop.f32.mrb[22].mxu1 }
 0xe95   : > { %v1330_v27 = vmax.f32 %v1325_v51, 0.0  ;;  %v1894_v28 = vpop.f32.mrb[23].mxu1 }
 0xe97   : > { %v1333_v29 = vpack.c.bf16 %v1330_v27, %v1330_v27 }
 0xe99   : > { %v1338_v30 = vsel %vm502_vm1, %v1333_v29, 0 }
 0xe9a   : > { %1896 = vmatpush3.bf16.msra.mxu0 %v1338_v30 }
 0xe9b   : > { %1909 = vmatprep.subr.bf16.mxu0 %v1990_v0 }
 0xe9d   : > { %1898 = vmatmul.mubr.msk.bf16.vlgmr.msra.gmra.mrb[28].mxu0 %vm498_vm2, %v1736_v31 }
 0xe9e   : > { %1911 = vmatprep.mubr.msk.bf16.mxu0 %vm1991_vm0, %v1990_v0 }
 0xf70   : > { %v1374_v32 = vpop.f32.mrb[28].mxu0 }
 0xf71   : > { %v1380_v33 = vadd.f32 %v1374_v32, %v1262_v9  ;;  %v1899_v35 = vpop.f32.mrb[29].mxu0 }
 0xf72   : > { %v1377_v37 = vpop.f32.mrb[30].mxu0 }
 0xf73   : > { %v1388_v38 = vadd.f32 %v1386_v36, %v1380_v33  ;;  %v1900_v39 = vpop.f32.mrb[31].mxu0 }
 0xf75   : > { %1392 = vrot.lane.b32.xlu1 %v1388_v38, %s2446_s0  ;;  %1389 = vrot.lane.b32.xlu0 %v1388_v38, %s2447_s27 }
 0xf79   : > { %1507 = vperm.xlu1 %1957, %v1747_v40   ;;  %1403 = vperm.xlu0 %1956, %v1740_v41  }
 0xf7d   : > { %1518 = vperm.xlu0 %1956, %v1749_v42  }
 0xfe7   : > { %v1393_v43 = vpop.permute.xlu1 %1392  ;;  %v1390_v44 = vpop.permute.xlu0 %1389 }
 0xfe8   : > { %v1394_v45 = vsel %vm632_vm14, %v1393_v43, 0.0  ;;  %v1742_v46 = vpack.c.bf16 %v1388_v38, %v1390_v44 }
 0xfe9   : > { %v1398_v47 = vpack.c.bf16 %v1394_v45, %v1394_v45 }
 0xfea   : > { %1902 = vmatpush3.bf16.msk.msra.mxu1 %vm2170_vm13, %v1742_v46 }
 0xfeb   : > { %1903 = vmatprep.subr.bf16.mxu1 %v1990_v0  ;;  %v1410_v48 = vsel %vm502_vm1, %v1398_v47, 0 }
 0xfee   : > { %1904 = vmatpush3.bf16.msra.mxu1 %v1410_v48 }
 0xfef   : > { %1915 = vmatprep.subr.bf16.mxu1 %v1990_v0 }
 0xff1   : > { %1906 = vmatmul.mubr.msk.bf16.vlgmr.msra.gmra.mrb[24].mxu1 %vm910_vm11, %v1739_v49 }
 0xff2   : > { %1917 = vmatprep.mubr.msk.bf16.mxu1 %vm1991_vm0, %v1990_v0 }
 0xff8   : > { %v1404_v15 = vpop.permute.xlu0 %1403  ;;  %v1508_v61 = vpop.permute.xlu1 %1507 }
 0xffc   : > { %v1519_v5 = vpop.permute.xlu0 %1518 }
0x10c4   : > { %v1446_v50 = vpop.f32.mrb[24].mxu1 }
0x10c5   : > { %v1447_v34 = vadd.f32 %v1446_v50, %v1404_v15  ;;  %v1907_v52 = vpop.f32.mrb[25].mxu1 }
0x10c6   : > { %v1449_v53 = vpop.f32.mrb[26].mxu1 }
0x10c7   : > { %v1452_v54 = vmax.f32 %v1447_v34, 0.0  ;;  %v1908_v55 = vpop.f32.mrb[27].mxu1 }
0x10c9   : > { %v1455_v56 = vpack.c.bf16 %v1452_v54, %v1452_v54 }
0x10cb   : > { %v1460_v57 = vsel %vm502_vm1, %v1455_v56, 0 }
0x10cc   : > { %1910 = vmatpush3.bf16.msra.mxu0 %v1460_v57 }
0x10cf   : > { %1912 = vmatmul.mubr.msk.bf16.vlgmr.msra.gmra.mrb[32].mxu0 %vm498_vm2, %v1745_v58 }
0x11a2   : > { %v1496_v59 = vpop.f32.mrb[32].mxu0 }
0x11a3   : > { %v1502_v60 = vadd.f32 %v1496_v59, %v1388_v38  ;;  %v1913_v0 = vpop.f32.mrb[33].mxu0 }
0x11a4   : > { %v1499_v62 = vpop.f32.mrb[34].mxu0 }
0x11a5   : > { %v1510_v63 = vadd.f32 %v1508_v61, %v1502_v60  ;;  %v1914_v1 = vpop.f32.mrb[35].mxu0 }
0x11a7   : > { %v1513_v2 = vpack.c.bf16 %v1510_v63, %v1510_v63 }
0x11a9   : > { %v1525_v3 = vsel %vm502_vm1, %v1513_v2, 0 }
0x11aa   : > { %1916 = vmatpush3.bf16.msra.mxu1 %v1525_v3 }
0x11ad   : > { %1918 = vmatmul.mubr.msk.bf16.vlgmr.msra.gmra.mrb[28].mxu1 %vm498_vm2, %v1748_v4 }
0x127d   : > { %1575 = sbr.rel (!%p2105_p4) target bundleno = 4748 (0x128c), region = 84 }
0x1280   : > { %v1561_v6 = vpop.f32.mrb[28].mxu1 }
0x1281   : > { %v1562_v7 = vadd.f32 %v1561_v6, %v1519_v5  ;;  %v1919_v8 = vpop.f32.mrb[29].mxu1 }
0x1282   : > { %v1564_v9 = vpop.f32.mrb[30].mxu1 }
0x1283   : > { %1751 = vst [vmem:[%s2239_s23 + $0x10] sm:$0x3f] %v1562_v7  ;;  %v1920_v10 = vpop.f32.mrb[31].mxu1 }
0x128a   : > { %v1613_v13 = vld [vmem:[%s2239_s23 + $0x10] sm:$0xff] }
0x128b   : > { %1614 = vst [vmem:[%s1577_s17 + $0x20] sm:$0xff] %v1613_v13 }
0x128c PF: > { %p22_p8 = scmp.ge.s32.totalorder %s2095_s22, 4   ;;  %s2450_s18 = smov %s1984_s19 }
0x128d   : > { %s2451_s19 = smov %s2103_s25  ;;  %s2452_s20 = smov %s2095_s22 }
0x128e   :  { %24 = sbr.rel (!%p22_p8) target bundleno = 4 (0x4), region = 170 }

</bundles_post_ra>
